<compile_context>
chip_gen: v7x
topology: tpu7x:2x2x1
jax: 0.10.0
libtpu: 0.0.40
codegen_flags: <defaults>
</compile_context>

<pallas_src>
import functools

import jax
import jax.numpy as jnp
from jax import lax
from jax.experimental import pallas as pl
from jax.experimental.pallas import tpu as pltpu


def _cluster_relu_kernel(idx_ref, inter_ref, x_ref, o_ref, p_ref, *, num_splits):
    # idx_ref:   (ct, 1,  HWp) int32  flat gather index per (channel, output position)
    # inter_ref: (ct, 1,  HWp) f32    interpolation factor per (channel, position)
    # x_ref:     (nb, ct, HWp) f32    activations, natural (N, C, HW) layout
    # o_ref:     (nb, ct, HWp) f32
    # p_ref:     (ct, HWp, HWp) bf16  VMEM scratch: per-channel one-hot gather matrix
    ct, hwp, _ = p_ref.shape
    nb = x_ref.shape[0]

    # Build the one-hot gather matrix once per channel tile (batch is the inner,
    # sequential grid axis), directly in the canonical (K=q, N=p) orientation:
    #   P[c, q, p] = 1  iff  q == idx[c, p]   =>   (x_row @ P[c])[p] == x_row[idx[c, p]]
    # Built channel-by-channel so the int32 iota temporary stays at (HWp, HWp).
    @pl.when(pl.program_id(1) == 0)
    def _():
        q = lax.broadcasted_iota(jnp.int32, (hwp, hwp), 0)
        for c in range(ct):
            p_ref[c] = (q == idx_ref[c]).astype(jnp.bfloat16)

    x = x_ref[...].astype(jnp.float32)            # (nb, ct, HWp)
    inter = inter_ref[...]                        # (ct, 1, HWp)

    for c in range(ct):                           # static unroll over the channel tile
        xc = x[:, c, :]                           # (nb, HWp)

        # Split x into bf16 pieces whose f32 sum reconstructs x (exact for normal-range
        # activations with num_splits=3); the 0/1 matmul then acts as a pure gather.
        # All pieces are stacked along rows so each channel pays a single MXU weight push.
        pieces = []
        r = xc
        for _ in range(num_splits - 1):
            hi = r.astype(jnp.bfloat16)
            pieces.append(hi)
            r = r - hi.astype(jnp.float32)
        pieces.append(r.astype(jnp.bfloat16))
        lhs = pieces[0] if num_splits == 1 else jnp.concatenate(pieces, axis=0)

        res = jnp.dot(lhs, p_ref[c], preferred_element_type=jnp.float32)  # (S*nb, HWp)
        proto = res[:nb]
        for s in range(1, num_splits):
            proto = proto + res[s * nb:(s + 1) * nb]

        itc = inter[c]                            # (1, HWp)
        pre = xc * (1.0 - itc) + proto * itc      # f32 blend, same expression as torch
        relu_map = (pre > 0.0).astype(xc.dtype)   # strict > 0
        out_c = (xc * relu_map).astype(o_ref.dtype)  # multiply (not select): torch NaN/-0 behaviour
        o_ref[:, pl.ds(c, 1), :] = out_c.reshape(nb, 1, hwp)


def _pick_channel_tile(C, HWp, p_budget_bytes=8 << 20, max_unroll=16):
    # Valid channel tiles: ct == C, or a multiple of 8 dividing C (channel is the
    # second-to-last dim of the x/out blocks -> (8, 128) sublane rule).
    cands = [d for d in range(8, C, 8) if C % d == 0]
    if C <= max_unroll:
        cands.append(C)
    good = [ct for ct in cands
            if ct * HWp * HWp * 2 <= p_budget_bytes and ct <= max_unroll]
    if good:
        return max(good)
    if cands:
        return min(cands)
    return C


def cluster_relu(x, rows, cols, inter, *, channel_tile=None, batch_tile=None,
                 num_splits=3):
    """ClusterRelu forward. x: (N,C,H,W); rows/cols: (C,H,W) int; inter: scalar or (C,H,W)."""
    N, C, H, W = x.shape
    HW = H * W
    HWp = ((HW + 127) // 128) * 128               # lane-dense last dim (pad q/p axes)

    # ---- gather index preparation (tiny, wrapper-side) ----
    rows = jnp.asarray(rows, jnp.int32)
    cols = jnp.asarray(cols, jnp.int32)
    rows = jnp.where(rows < 0, rows + H, rows)    # torch-style negative index wrap
    cols = jnp.where(cols < 0, cols + W, cols)
    # TODO(synk): PyTorch advanced indexing raises on out-of-range prototype indices;
    #             here they are clamped into range instead of erroring.
    rows = jnp.clip(rows, 0, H - 1)
    cols = jnp.clip(cols, 0, W - 1)
    idx = (rows * W + cols).reshape(C, 1, HW)

    inter3 = jnp.broadcast_to(jnp.asarray(inter, jnp.float32),
                              (C, H, W)).reshape(C, 1, HW)

    x_flat = x.reshape(N, C, HW)                  # free (row-major), no HBM transpose
    if HWp != HW:
        pad = HWp - HW
        idx = jnp.pad(idx, ((0, 0), (0, 0), (0, pad)))
        inter3 = jnp.pad(inter3, ((0, 0), (0, 0), (0, pad)))
        x_flat = jnp.pad(x_flat, ((0, 0), (0, 0), (0, pad)))

    # ---- tiling ----
    ct = _pick_channel_tile(C, HWp) if channel_tile is None else int(channel_tile)
    assert C % ct == 0, "channel_tile must divide C"
    if batch_tile is None:
        x_budget = 3 << 20                        # ~3 MiB of x per block
        nb = max(1, min(N, x_budget // (ct * HWp * 4)))
    else:
        nb = int(batch_tile)
    n_steps = -(-N // nb)                         # cdiv
    Np = n_steps * nb
    if Np != N:                                   # pad batch so the grid is exact
        x_flat = jnp.pad(x_flat, ((0, Np - N), (0, 0), (0, 0)))

    # Explicit VMEM budget: above v5e's small default scoped limit, below v7x's
    # 64 MiB physical VMEM.
    try:
        vmem_cap = pltpu.get_tpu_info().vmem_capacity_bytes
    except Exception:
        vmem_cap = 64 << 20
    vmem_limit = int(min(vmem_cap * 3 // 4, 96 << 20))

    grid = (C // ct, n_steps)                     # channel tiles outer, batch inner

    kernel = functools.partial(_cluster_relu_kernel, num_splits=num_splits)
    out = pl.pallas_call(
        kernel,
        out_shape=jax.ShapeDtypeStruct((Np, C, HWp), x.dtype),
        grid=grid,
        in_specs=[
            pl.BlockSpec((ct, 1, HWp), lambda cj, ni: (cj, 0, 0)),    # idx (constant along batch)
            pl.BlockSpec((ct, 1, HWp), lambda cj, ni: (cj, 0, 0)),    # inter
            pl.BlockSpec((nb, ct, HWp), lambda cj, ni: (ni, cj, 0)),  # x
        ],
        out_specs=pl.BlockSpec((nb, ct, HWp), lambda cj, ni: (ni, cj, 0)),
        scratch_shapes=[pltpu.VMEM((ct, HWp, HWp), jnp.bfloat16)],    # one-hot, single copy
        compiler_params=pltpu.CompilerParams(
            dimension_semantics=("parallel", "arbitrary"),
            vmem_limit_bytes=vmem_limit),
    )(idx, inter3, x_flat)

    return out[:N, :, :HW].reshape(N, C, H, W)


def cluster_relu_reference(x, rows, cols, inter):
    # Pure-JAX reference mirroring the PyTorch advanced indexing.
    N, C, H, W = x.shape
    c_idx = jnp.arange(C)[:, None, None]          # channel_indices
    proto = x[:, c_idx, rows, cols]               # (N, C, H, W)
    relu_map = (x * (1.0 - inter) + proto * inter) > 0
    return x * relu_map.astype(x.dtype)


if __name__ == "__main__":
    key = jax.random.PRNGKey(0)
    k_x, k_r, k_c, k_i = jax.random.split(key, 4)
    N, C, H, W = 2, 4, 16, 16

    x = jax.random.normal(k_x, (N, C, H, W), dtype=jnp.float32)
    # prototype[0] = rows, prototype[1] = cols (module parameter of shape (2, C, H, W))
    rows = jax.random.randint(k_r, (C, H, W), 0, H, dtype=jnp.int32)
    cols = jax.random.randint(k_c, (C, H, W), 0, W, dtype=jnp.int32)
    # "inter" parameter constrained to [0, 1].
    inter = jax.random.uniform(k_i, (C, H, W), dtype=jnp.float32)

    out = jax.block_until_ready(cluster_relu(x, rows, cols, inter))
    ref = cluster_relu_reference(x, rows, cols, inter)

    assert out.shape == (N, C, H, W) and out.dtype == x.dtype
    assert jnp.allclose(out, ref, atol=1e-6, rtol=1e-6), "mismatch vs reference"
    print("KERNEL_OK")
</pallas_src>

<mosaic_0001>
module attributes {stable_mosaic.version = 11 : i64} {
  func.func @_cluster_relu_kernel(%arg0: i32, %arg1: i32, %arg2: memref<4x1x256xi32, #tpu.memory_space<vmem>>, %arg3: memref<4x1x256xf32, #tpu.memory_space<vmem>>, %arg4: memref<2x4x256xf32, #tpu.memory_space<vmem>>, %arg5: memref<2x4x256xf32, #tpu.memory_space<vmem>>, %arg6: memref<4x256x256xbf16, #tpu.memory_space<vmem>>) attributes {dimension_semantics = [#tpu.dimension_semantics<parallel>, #tpu.dimension_semantics<arbitrary>], iteration_bounds = array<i64: 1, 1>, scalar_prefetch = 0 : i64, scratch_operands = 1 : i64, tpu.core_type = #tpu.core_type<tc>, window_params = [{transform_indices = @transform_0, window_bounds = array<i64: 4, 1, 256>}, {transform_indices = @transform_1, window_bounds = array<i64: 4, 1, 256>}, {transform_indices = @transform_2, window_bounds = array<i64: 2, 4, 256>}, {transform_indices = @transform_3, window_bounds = array<i64: 2, 4, 256>}]} {
    %c0_i32 = arith.constant 0 : i32
    %0 = arith.cmpi eq, %arg1, %c0_i32 : i32
    %1 = arith.extui %0 : i1 to i32
    %c0_i32_0 = arith.constant 0 : i32
    %2 = arith.cmpi ne, %1, %c0_i32_0 : i32
    scf.if %2 {
      %141 = tpu.iota {dimensions = array<i32: 0>} : vector<256x256xi32>
      %c0_38 = arith.constant 0 : index
      %c0_39 = arith.constant 0 : index
      %c0_40 = arith.constant 0 : index
      %142 = vector.load %arg2[%c0_38, %c0_39, %c0_40] : memref<4x1x256xi32, #tpu.memory_space<vmem>>, vector<1x1x256xi32>
      %143 = vector.shape_cast %142 : vector<1x1x256xi32> to vector<1x256xi32>
      %144 = vector.broadcast %143 : vector<1x256xi32> to vector<256x256xi32>
      %145 = arith.cmpi eq, %141, %144 : vector<256x256xi32>
      %146 = arith.extui %145 : vector<256x256xi1> to vector<256x256xi32>
      %147 = arith.sitofp %146 : vector<256x256xi32> to vector<256x256xf32>
      %148 = arith.truncf %147 : vector<256x256xf32> to vector<256x256xbf16>
      %c0_41 = arith.constant 0 : index
      %c0_42 = arith.constant 0 : index
      %c0_43 = arith.constant 0 : index
      %149 = vector.load %arg6[%c0_41, %c0_42, %c0_43] : memref<4x256x256xbf16, #tpu.memory_space<vmem>>, vector<1x256x256xbf16>
      %150 = vector.shape_cast %149 : vector<1x256x256xbf16> to vector<256x256xbf16>
      %151 = vector.shape_cast %148 : vector<256x256xbf16> to vector<1x256x256xbf16>
      tpu.vector_store %arg6[%c0_41, %c0_42, %c0_43], %151 {strides = array<i32>} : memref<4x256x256xbf16, #tpu.memory_space<vmem>>, vector<1x256x256xbf16>,
      %c1_44 = arith.constant 1 : index
      %c0_45 = arith.constant 0 : index
      %c0_46 = arith.constant 0 : index
      %152 = vector.load %arg2[%c1_44, %c0_45, %c0_46] : memref<4x1x256xi32, #tpu.memory_space<vmem>>, vector<1x1x256xi32>
      %153 = vector.shape_cast %152 : vector<1x1x256xi32> to vector<1x256xi32>
      %154 = vector.broadcast %153 : vector<1x256xi32> to vector<256x256xi32>
      %155 = arith.cmpi eq, %141, %154 : vector<256x256xi32>
      %156 = arith.extui %155 : vector<256x256xi1> to vector<256x256xi32>
      %157 = arith.sitofp %156 : vector<256x256xi32> to vector<256x256xf32>
      %158 = arith.truncf %157 : vector<256x256xf32> to vector<256x256xbf16>
      %c1_47 = arith.constant 1 : index
      %c0_48 = arith.constant 0 : index
      %c0_49 = arith.constant 0 : index
      %159 = vector.load %arg6[%c1_47, %c0_48, %c0_49] : memref<4x256x256xbf16, #tpu.memory_space<vmem>>, vector<1x256x256xbf16>
      %160 = vector.shape_cast %159 : vector<1x256x256xbf16> to vector<256x256xbf16>
      %161 = vector.shape_cast %158 : vector<256x256xbf16> to vector<1x256x256xbf16>
      tpu.vector_store %arg6[%c1_47, %c0_48, %c0_49], %161 {strides = array<i32>} : memref<4x256x256xbf16, #tpu.memory_space<vmem>>, vector<1x256x256xbf16>,
      %c2_50 = arith.constant 2 : index
      %c0_51 = arith.constant 0 : index
      %c0_52 = arith.constant 0 : index
      %162 = vector.load %arg2[%c2_50, %c0_51, %c0_52] : memref<4x1x256xi32, #tpu.memory_space<vmem>>, vector<1x1x256xi32>
      %163 = vector.shape_cast %162 : vector<1x1x256xi32> to vector<1x256xi32>
      %164 = vector.broadcast %163 : vector<1x256xi32> to vector<256x256xi32>
      %165 = arith.cmpi eq, %141, %164 : vector<256x256xi32>
      %166 = arith.extui %165 : vector<256x256xi1> to vector<256x256xi32>
      %167 = arith.sitofp %166 : vector<256x256xi32> to vector<256x256xf32>
      %168 = arith.truncf %167 : vector<256x256xf32> to vector<256x256xbf16>
      %c2_53 = arith.constant 2 : index
      %c0_54 = arith.constant 0 : index
      %c0_55 = arith.constant 0 : index
      %169 = vector.load %arg6[%c2_53, %c0_54, %c0_55] : memref<4x256x256xbf16, #tpu.memory_space<vmem>>, vector<1x256x256xbf16>
      %170 = vector.shape_cast %169 : vector<1x256x256xbf16> to vector<256x256xbf16>
      %171 = vector.shape_cast %168 : vector<256x256xbf16> to vector<1x256x256xbf16>
      tpu.vector_store %arg6[%c2_53, %c0_54, %c0_55], %171 {strides = array<i32>} : memref<4x256x256xbf16, #tpu.memory_space<vmem>>, vector<1x256x256xbf16>,
      %c3_56 = arith.constant 3 : index
      %c0_57 = arith.constant 0 : index
      %c0_58 = arith.constant 0 : index
      %172 = vector.load %arg2[%c3_56, %c0_57, %c0_58] : memref<4x1x256xi32, #tpu.memory_space<vmem>>, vector<1x1x256xi32>
      %173 = vector.shape_cast %172 : vector<1x1x256xi32> to vector<1x256xi32>
      %174 = vector.broadcast %173 : vector<1x256xi32> to vector<256x256xi32>
      %175 = arith.cmpi eq, %141, %174 : vector<256x256xi32>
      %176 = arith.extui %175 : vector<256x256xi1> to vector<256x256xi32>
      %177 = arith.sitofp %176 : vector<256x256xi32> to vector<256x256xf32>
      %178 = arith.truncf %177 : vector<256x256xf32> to vector<256x256xbf16>
      %c3_59 = arith.constant 3 : index
      %c0_60 = arith.constant 0 : index
      %c0_61 = arith.constant 0 : index
      %179 = vector.load %arg6[%c3_59, %c0_60, %c0_61] : memref<4x256x256xbf16, #tpu.memory_space<vmem>>, vector<1x256x256xbf16>
      %180 = vector.shape_cast %179 : vector<1x256x256xbf16> to vector<256x256xbf16>
      %181 = vector.shape_cast %178 : vector<256x256xbf16> to vector<1x256x256xbf16>
      tpu.vector_store %arg6[%c3_59, %c0_60, %c0_61], %181 {strides = array<i32>} : memref<4x256x256xbf16, #tpu.memory_space<vmem>>, vector<1x256x256xbf16>,
    } else {
    }
    %c0 = arith.constant 0 : index
    %c0_1 = arith.constant 0 : index
    %c0_2 = arith.constant 0 : index
    %3 = vector.load %arg4[%c0, %c0_1, %c0_2] : memref<2x4x256xf32, #tpu.memory_space<vmem>>, vector<2x4x256xf32>
    %c0_3 = arith.constant 0 : index
    %c0_4 = arith.constant 0 : index
    %c0_5 = arith.constant 0 : index
    %4 = vector.load %arg3[%c0_3, %c0_4, %c0_5] : memref<4x1x256xf32, #tpu.memory_space<vmem>>, vector<4x1x256xf32>
    %5 = vector.extract_strided_slice %3 {offsets = [0, 0, 0], sizes = [2, 1, 256], strides = [1, 1, 1]} : vector<2x4x256xf32> to vector<2x1x256xf32>
    %6 = vector.shape_cast %5 : vector<2x1x256xf32> to vector<2x256xf32>
    %7 = arith.truncf %6 : vector<2x256xf32> to vector<2x256xbf16>
    %8 = arith.extf %7 : vector<2x256xbf16> to vector<2x256xf32>
    %9 = arith.subf %6, %8 : vector<2x256xf32>
    %10 = arith.truncf %9 : vector<2x256xf32> to vector<2x256xbf16>
    %11 = arith.extf %10 : vector<2x256xbf16> to vector<2x256xf32>
    %12 = arith.subf %9, %11 : vector<2x256xf32>
    %13 = arith.truncf %12 : vector<2x256xf32> to vector<2x256xbf16>
    %14 = tpu.concatenate %7, %10, %13 in 0 : vector<2x256xbf16>, vector<2x256xbf16>, vector<2x256xbf16> -> vector<6x256xbf16>
    %c0_6 = arith.constant 0 : index
    %c0_7 = arith.constant 0 : index
    %c0_8 = arith.constant 0 : index
    %15 = vector.load %arg6[%c0_6, %c0_7, %c0_8] : memref<4x256x256xbf16, #tpu.memory_space<vmem>>, vector<1x256x256xbf16>
    %16 = vector.shape_cast %15 : vector<1x256x256xbf16> to vector<256x256xbf16>
    %cst = arith.constant dense<0.000000e+00> : vector<6x256xf32>
    %17 = tpu.matmul %14, %16, %cst {dimension_numbers = #tpu.dot_dimension_numbers<[1], [0], [0], [1], [0, 0, 1, 1], [], []>} : vector<6x256xbf16>, vector<256x256xbf16>, vector<6x256xf32> -> vector<6x256xf32>
    %18 = vector.extract_strided_slice %17 {offsets = [0, 0], sizes = [2, 256], strides = [1, 1]} : vector<6x256xf32> to vector<2x256xf32>
    %19 = vector.extract_strided_slice %17 {offsets = [2, 0], sizes = [2, 256], strides = [1, 1]} : vector<6x256xf32> to vector<2x256xf32>
    %20 = arith.addf %18, %19 : vector<2x256xf32>
    %21 = vector.extract_strided_slice %17 {offsets = [4, 0], sizes = [2, 256], strides = [1, 1]} : vector<6x256xf32> to vector<2x256xf32>
    %22 = arith.addf %20, %21 : vector<2x256xf32>
    %23 = vector.extract_strided_slice %4 {offsets = [0, 0, 0], sizes = [1, 1, 256], strides = [1, 1, 1]} : vector<4x1x256xf32> to vector<1x1x256xf32>
    %24 = vector.shape_cast %23 : vector<1x1x256xf32> to vector<1x256xf32>
    %cst_9 = arith.constant 1.000000e+00 : f32
    %25 = vector.broadcast %cst_9 : f32 to vector<1x256xf32>
    %26 = arith.subf %25, %24 : vector<1x256xf32>
    %27 = vector.broadcast %26 : vector<1x256xf32> to vector<2x256xf32>
    %28 = arith.mulf %6, %27 : vector<2x256xf32>
    %29 = vector.broadcast %24 : vector<1x256xf32> to vector<2x256xf32>
    %30 = arith.mulf %22, %29 : vector<2x256xf32>
    %31 = arith.addf %28, %30 : vector<2x256xf32>
    %cst_10 = arith.constant 0.000000e+00 : f32
    %32 = vector.broadcast %cst_10 : f32 to vector<2x256xf32>
    %33 = arith.cmpf ogt, %31, %32 : vector<2x256xf32>
    %34 = arith.extui %33 : vector<2x256xi1> to vector<2x256xi32>
    %35 = arith.sitofp %34 : vector<2x256xi32> to vector<2x256xf32>
    %36 = arith.mulf %6, %35 : vector<2x256xf32>
    %37 = vector.shape_cast %36 : vector<2x256xf32> to vector<2x1x256xf32>
    %c0_11 = arith.constant 0 : index
    %c0_12 = arith.constant 0 : index
    %c0_13 = arith.constant 0 : index
    %38 = vector.load %arg5[%c0_11, %c0_12, %c0_13] : memref<2x4x256xf32, #tpu.memory_space<vmem>>, vector<2x1x256xf32>
    tpu.vector_store %arg5[%c0_11, %c0_12, %c0_13], %37 {strides = array<i32>} : memref<2x4x256xf32, #tpu.memory_space<vmem>>, vector<2x1x256xf32>,
    %39 = vector.extract_strided_slice %3 {offsets = [0, 1, 0], sizes = [2, 1, 256], strides = [1, 1, 1]} : vector<2x4x256xf32> to vector<2x1x256xf32>
    %40 = vector.shape_cast %39 : vector<2x1x256xf32> to vector<2x256xf32>
    %41 = arith.truncf %40 : vector<2x256xf32> to vector<2x256xbf16>
    %42 = arith.extf %41 : vector<2x256xbf16> to vector<2x256xf32>
    %43 = arith.subf %40, %42 : vector<2x256xf32>
    %44 = arith.truncf %43 : vector<2x256xf32> to vector<2x256xbf16>
    %45 = arith.extf %44 : vector<2x256xbf16> to vector<2x256xf32>
    %46 = arith.subf %43, %45 : vector<2x256xf32>
    %47 = arith.truncf %46 : vector<2x256xf32> to vector<2x256xbf16>
    %48 = tpu.concatenate %41, %44, %47 in 0 : vector<2x256xbf16>, vector<2x256xbf16>, vector<2x256xbf16> -> vector<6x256xbf16>
    %c1 = arith.constant 1 : index
    %c0_14 = arith.constant 0 : index
    %c0_15 = arith.constant 0 : index
    %49 = vector.load %arg6[%c1, %c0_14, %c0_15] : memref<4x256x256xbf16, #tpu.memory_space<vmem>>, vector<1x256x256xbf16>
    %50 = vector.shape_cast %49 : vector<1x256x256xbf16> to vector<256x256xbf16>
    %cst_16 = arith.constant dense<0.000000e+00> : vector<6x256xf32>
    %51 = tpu.matmul %48, %50, %cst_16 {dimension_numbers = #tpu.dot_dimension_numbers<[1], [0], [0], [1], [0, 0, 1, 1], [], []>} : vector<6x256xbf16>, vector<256x256xbf16>, vector<6x256xf32> -> vector<6x256xf32>
    %52 = vector.extract_strided_slice %51 {offsets = [0, 0], sizes = [2, 256], strides = [1, 1]} : vector<6x256xf32> to vector<2x256xf32>
    %53 = vector.extract_strided_slice %51 {offsets = [2, 0], sizes = [2, 256], strides = [1, 1]} : vector<6x256xf32> to vector<2x256xf32>
    %54 = arith.addf %52, %53 : vector<2x256xf32>
    %55 = vector.extract_strided_slice %51 {offsets = [4, 0], sizes = [2, 256], strides = [1, 1]} : vector<6x256xf32> to vector<2x256xf32>
    %56 = arith.addf %54, %55 : vector<2x256xf32>
    %57 = vector.extract_strided_slice %4 {offsets = [1, 0, 0], sizes = [1, 1, 256], strides = [1, 1, 1]} : vector<4x1x256xf32> to vector<1x1x256xf32>
    %58 = vector.shape_cast %57 : vector<1x1x256xf32> to vector<1x256xf32>
    %cst_17 = arith.constant 1.000000e+00 : f32
    %59 = vector.broadcast %cst_17 : f32 to vector<1x256xf32>
    %60 = arith.subf %59, %58 : vector<1x256xf32>
    %61 = vector.broadcast %60 : vector<1x256xf32> to vector<2x256xf32>
    %62 = arith.mulf %40, %61 : vector<2x256xf32>
    %63 = vector.broadcast %58 : vector<1x256xf32> to vector<2x256xf32>
    %64 = arith.mulf %56, %63 : vector<2x256xf32>
    %65 = arith.addf %62, %64 : vector<2x256xf32>
    %cst_18 = arith.constant 0.000000e+00 : f32
    %66 = vector.broadcast %cst_18 : f32 to vector<2x256xf32>
    %67 = arith.cmpf ogt, %65, %66 : vector<2x256xf32>
    %68 = arith.extui %67 : vector<2x256xi1> to vector<2x256xi32>
    %69 = arith.sitofp %68 : vector<2x256xi32> to vector<2x256xf32>
    %70 = arith.mulf %40, %69 : vector<2x256xf32>
    %71 = vector.shape_cast %70 : vector<2x256xf32> to vector<2x1x256xf32>
    %c0_19 = arith.constant 0 : index
    %c1_20 = arith.constant 1 : index
    %c0_21 = arith.constant 0 : index
    %72 = vector.load %arg5[%c0_19, %c1_20, %c0_21] : memref<2x4x256xf32, #tpu.memory_space<vmem>>, vector<2x1x256xf32>
    tpu.vector_store %arg5[%c0_19, %c1_20, %c0_21], %71 {strides = array<i32>} : memref<2x4x256xf32, #tpu.memory_space<vmem>>, vector<2x1x256xf32>,
    %73 = vector.extract_strided_slice %3 {offsets = [0, 2, 0], sizes = [2, 1, 256], strides = [1, 1, 1]} : vector<2x4x256xf32> to vector<2x1x256xf32>
    %74 = vector.shape_cast %73 : vector<2x1x256xf32> to vector<2x256xf32>
    %75 = arith.truncf %74 : vector<2x256xf32> to vector<2x256xbf16>
    %76 = arith.extf %75 : vector<2x256xbf16> to vector<2x256xf32>
    %77 = arith.subf %74, %76 : vector<2x256xf32>
    %78 = arith.truncf %77 : vector<2x256xf32> to vector<2x256xbf16>
    %79 = arith.extf %78 : vector<2x256xbf16> to vector<2x256xf32>
    %80 = arith.subf %77, %79 : vector<2x256xf32>
    %81 = arith.truncf %80 : vector<2x256xf32> to vector<2x256xbf16>
    %82 = tpu.concatenate %75, %78, %81 in 0 : vector<2x256xbf16>, vector<2x256xbf16>, vector<2x256xbf16> -> vector<6x256xbf16>
    %c2 = arith.constant 2 : index
    %c0_22 = arith.constant 0 : index
    %c0_23 = arith.constant 0 : index
    %83 = vector.load %arg6[%c2, %c0_22, %c0_23] : memref<4x256x256xbf16, #tpu.memory_space<vmem>>, vector<1x256x256xbf16>
    %84 = vector.shape_cast %83 : vector<1x256x256xbf16> to vector<256x256xbf16>
    %cst_24 = arith.constant dense<0.000000e+00> : vector<6x256xf32>
    %85 = tpu.matmul %82, %84, %cst_24 {dimension_numbers = #tpu.dot_dimension_numbers<[1], [0], [0], [1], [0, 0, 1, 1], [], []>} : vector<6x256xbf16>, vector<256x256xbf16>, vector<6x256xf32> -> vector<6x256xf32>
    %86 = vector.extract_strided_slice %85 {offsets = [0, 0], sizes = [2, 256], strides = [1, 1]} : vector<6x256xf32> to vector<2x256xf32>
    %87 = vector.extract_strided_slice %85 {offsets = [2, 0], sizes = [2, 256], strides = [1, 1]} : vector<6x256xf32> to vector<2x256xf32>
    %88 = arith.addf %86, %87 : vector<2x256xf32>
    %89 = vector.extract_strided_slice %85 {offsets = [4, 0], sizes = [2, 256], strides = [1, 1]} : vector<6x256xf32> to vector<2x256xf32>
    %90 = arith.addf %88, %89 : vector<2x256xf32>
    %91 = vector.extract_strided_slice %4 {offsets = [2, 0, 0], sizes = [1, 1, 256], strides = [1, 1, 1]} : vector<4x1x256xf32> to vector<1x1x256xf32>
    %92 = vector.shape_cast %91 : vector<1x1x256xf32> to vector<1x256xf32>
    %cst_25 = arith.constant 1.000000e+00 : f32
    %93 = vector.broadcast %cst_25 : f32 to vector<1x256xf32>
    %94 = arith.subf %93, %92 : vector<1x256xf32>
    %95 = vector.broadcast %94 : vector<1x256xf32> to vector<2x256xf32>
    %96 = arith.mulf %74, %95 : vector<2x256xf32>
    %97 = vector.broadcast %92 : vector<1x256xf32> to vector<2x256xf32>
    %98 = arith.mulf %90, %97 : vector<2x256xf32>
    %99 = arith.addf %96, %98 : vector<2x256xf32>
    %cst_26 = arith.constant 0.000000e+00 : f32
    %100 = vector.broadcast %cst_26 : f32 to vector<2x256xf32>
    %101 = arith.cmpf ogt, %99, %100 : vector<2x256xf32>
    %102 = arith.extui %101 : vector<2x256xi1> to vector<2x256xi32>
    %103 = arith.sitofp %102 : vector<2x256xi32> to vector<2x256xf32>
    %104 = arith.mulf %74, %103 : vector<2x256xf32>
    %105 = vector.shape_cast %104 : vector<2x256xf32> to vector<2x1x256xf32>
    %c0_27 = arith.constant 0 : index
    %c2_28 = arith.constant 2 : index
    %c0_29 = arith.constant 0 : index
    %106 = vector.load %arg5[%c0_27, %c2_28, %c0_29] : memref<2x4x256xf32, #tpu.memory_space<vmem>>, vector<2x1x256xf32>
    tpu.vector_store %arg5[%c0_27, %c2_28, %c0_29], %105 {strides = array<i32>} : memref<2x4x256xf32, #tpu.memory_space<vmem>>, vector<2x1x256xf32>,
    %107 = vector.extract_strided_slice %3 {offsets = [0, 3, 0], sizes = [2, 1, 256], strides = [1, 1, 1]} : vector<2x4x256xf32> to vector<2x1x256xf32>
    %108 = vector.shape_cast %107 : vector<2x1x256xf32> to vector<2x256xf32>
    %109 = arith.truncf %108 : vector<2x256xf32> to vector<2x256xbf16>
    %110 = arith.extf %109 : vector<2x256xbf16> to vector<2x256xf32>
    %111 = arith.subf %108, %110 : vector<2x256xf32>
    %112 = arith.truncf %111 : vector<2x256xf32> to vector<2x256xbf16>
    %113 = arith.extf %112 : vector<2x256xbf16> to vector<2x256xf32>
    %114 = arith.subf %111, %113 : vector<2x256xf32>
    %115 = arith.truncf %114 : vector<2x256xf32> to vector<2x256xbf16>
    %116 = tpu.concatenate %109, %112, %115 in 0 : vector<2x256xbf16>, vector<2x256xbf16>, vector<2x256xbf16> -> vector<6x256xbf16>
    %c3 = arith.constant 3 : index
    %c0_30 = arith.constant 0 : index
    %c0_31 = arith.constant 0 : index
    %117 = vector.load %arg6[%c3, %c0_30, %c0_31] : memref<4x256x256xbf16, #tpu.memory_space<vmem>>, vector<1x256x256xbf16>
    %118 = vector.shape_cast %117 : vector<1x256x256xbf16> to vector<256x256xbf16>
    %cst_32 = arith.constant dense<0.000000e+00> : vector<6x256xf32>
    %119 = tpu.matmul %116, %118, %cst_32 {dimension_numbers = #tpu.dot_dimension_numbers<[1], [0], [0], [1], [0, 0, 1, 1], [], []>} : vector<6x256xbf16>, vector<256x256xbf16>, vector<6x256xf32> -> vector<6x256xf32>
    %120 = vector.extract_strided_slice %119 {offsets = [0, 0], sizes = [2, 256], strides = [1, 1]} : vector<6x256xf32> to vector<2x256xf32>
    %121 = vector.extract_strided_slice %119 {offsets = [2, 0], sizes = [2, 256], strides = [1, 1]} : vector<6x256xf32> to vector<2x256xf32>
    %122 = arith.addf %120, %121 : vector<2x256xf32>
    %123 = vector.extract_strided_slice %119 {offsets = [4, 0], sizes = [2, 256], strides = [1, 1]} : vector<6x256xf32> to vector<2x256xf32>
    %124 = arith.addf %122, %123 : vector<2x256xf32>
    %125 = vector.extract_strided_slice %4 {offsets = [3, 0, 0], sizes = [1, 1, 256], strides = [1, 1, 1]} : vector<4x1x256xf32> to vector<1x1x256xf32>
    %126 = vector.shape_cast %125 : vector<1x1x256xf32> to vector<1x256xf32>
    %cst_33 = arith.constant 1.000000e+00 : f32
    %127 = vector.broadcast %cst_33 : f32 to vector<1x256xf32>
    %128 = arith.subf %127, %126 : vector<1x256xf32>
    %129 = vector.broadcast %128 : vector<1x256xf32> to vector<2x256xf32>
    %130 = arith.mulf %108, %129 : vector<2x256xf32>
    %131 = vector.broadcast %126 : vector<1x256xf32> to vector<2x256xf32>
    %132 = arith.mulf %124, %131 : vector<2x256xf32>
    %133 = arith.addf %130, %132 : vector<2x256xf32>
    %cst_34 = arith.constant 0.000000e+00 : f32
    %134 = vector.broadcast %cst_34 : f32 to vector<2x256xf32>
    %135 = arith.cmpf ogt, %133, %134 : vector<2x256xf32>
    %136 = arith.extui %135 : vector<2x256xi1> to vector<2x256xi32>
    %137 = arith.sitofp %136 : vector<2x256xi32> to vector<2x256xf32>
    %138 = arith.mulf %108, %137 : vector<2x256xf32>
    %139 = vector.shape_cast %138 : vector<2x256xf32> to vector<2x1x256xf32>
    %c0_35 = arith.constant 0 : index
    %c3_36 = arith.constant 3 : index
    %c0_37 = arith.constant 0 : index
    %140 = vector.load %arg5[%c0_35, %c3_36, %c0_37] : memref<2x4x256xf32, #tpu.memory_space<vmem>>, vector<2x1x256xf32>
    tpu.vector_store %arg5[%c0_35, %c3_36, %c0_37], %139 {strides = array<i32>} : memref<2x4x256xf32, #tpu.memory_space<vmem>>, vector<2x1x256xf32>,
    return
  }
  func.func @transform_0(%arg0: i32, %arg1: i32) -> (i32, i32, i32) {
    %c0_i32 = arith.constant 0 : i32
    %c0_i32_0 = arith.constant 0 : i32
    %c0_i32_1 = arith.constant 0 : i32
    return %arg0, %c0_i32, %c0_i32_0 : i32, i32, i32
  }
  func.func @transform_1(%arg0: i32, %arg1: i32) -> (i32, i32, i32) {
    %c0_i32 = arith.constant 0 : i32
    %c0_i32_0 = arith.constant 0 : i32
    %c0_i32_1 = arith.constant 0 : i32
    return %arg0, %c0_i32, %c0_i32_0 : i32, i32, i32
  }
  func.func @transform_2(%arg0: i32, %arg1: i32) -> (i32, i32, i32) {
    %c0_i32 = arith.constant 0 : i32
    %c0_i32_0 = arith.constant 0 : i32
    return %arg1, %arg0, %c0_i32 : i32, i32, i32
  }
  func.func @transform_3(%arg0: i32, %arg1: i32) -> (i32, i32, i32) {
    %c0_i32 = arith.constant 0 : i32
    %c0_i32_0 = arith.constant 0 : i32
    return %arg1, %arg0, %c0_i32 : i32, i32, i32
  }
}

</mosaic_0001>

<bundles_post_ra>
// kernel: tpu_custom_call.1
= control target key start
LH: loop header
LB: loop body
LE: loop exit
PB: predicated region body
PF: predicated region fallthrough
CT: control target
= control target key end

     0   :  { %8 = vsyncpa [#allocation4], 0  ;;  %s4907_s0 = inlined_call_operand.hbm [shape: s32[4,1,256], index: 0, kind: input, shape index: {}]   ;;  %s4908_s1 = inlined_call_operand.hbm [shape: f32[4,1,256], index: 1, kind: input, shape index: {}]   ;;  %s4909_s2 = inlined_call_operand.hbm [shape: f32[2,4,256], index: 2, kind: input, shape index: {}]   ;;  %s4910_s3 = inlined_call_operand.hbm [shape: f32[2,4,256], index: 3, kind: output, shape index: {}]  }
   0x1   :  { %9 = vsyncpa [#allocation7], 0 }
   0x2   :  { %10 = vsyncpa [#allocation5], 0  ;;  %s3155_s12 = smov [#allocation6]   ;;  %s3156_s14 = smov [#allocation3]  }
   0x3   :  { %s28_s13 = sshll.u32 %s3155_s12, 4  ;;  %s16_s15 = sshll.u32 %s3156_s14, 4  ;;  %s29_s13 = int_to_ptr.vmem [resolvable:$true] %s28_s13  ;;  %s3186_s15 = int_to_ptr.vmem [resolvable:$true] %s16_s15 }
   0x4   :  { %s3061_s18 = scalar_lea.hbm %s4908_s1, 128 }
   0x5   :  { %p3062_p0 = scmp.ne.s32.totalorder %s4908_s1, %s3061_s18  ;;  %p3065_p1 = scmp.lt.u32.totalorder %s3061_s18, %s4908_s1 }
   0x7   :  { %p3067_p2 = pnand %p3065_p1, %p3062_p0 }
   0x9   :  { %3070 = shalt.err (!%p3067_p2)
}
   0xa   :  { %s3071_s23 = scalar_lea.vmem %s29_s13, 128  ;;  %p3076_p4 = scmp.lt.s32.totalorder %s29_s13, %s29_s13 }
   0xb   :  { %p3072_p3 = scmp.ne.s32.totalorder %s29_s13, %s3071_s23  ;;  %p3077_p5 = scmp.lt.s32.totalorder %s3071_s23, %s3071_s23 }
   0xd   :  { %p3078_p6 = por %p3077_p5, %p3076_p4 }
   0xf   :  { %p3079_p7 = pnand %p3078_p6, %p3072_p3 }
  0x11   :  { %3082 = shalt.err (!%p3079_p7)
}
  0x12   :  { %s3157_s24 = smov 32   ;;  %s3158_s25 = smov 2  }
  0x13   :  { %34 = dma.hbm_to_vmem [thread:$0]  %s4908_s1, 128, %s29_s13, [#allocation7], %s3157_s24, %s3157_s24, %s3158_s25  }
  0x14   :  { %s3083_s30 = scalar_lea.hbm %s4907_s0, 128 }
  0x15   :  { %p3084_p8 = scmp.ne.s32.totalorder %s4907_s0, %s3083_s30  ;;  %p3087_p9 = scmp.lt.u32.totalorder %s3083_s30, %s4907_s0 }
  0x17   :  { %p3089_p10 = pnand %p3087_p9, %p3084_p8 }
  0x19   :  { %3092 = shalt.err (!%p3089_p10)
}
  0x1a   :  { %s3093_s8 = scalar_lea.vmem %s3186_s15, 128  ;;  %p3098_p12 = scmp.lt.s32.totalorder %s3186_s15, %s3186_s15 }
  0x1b   :  { %p3094_p11 = scmp.ne.s32.totalorder %s3186_s15, %s3093_s8  ;;  %p3099_p13 = scmp.lt.s32.totalorder %s3093_s8, %s3093_s8 }
  0x1d   :  { %p3100_p0 = por %p3099_p13, %p3098_p12 }
  0x1f   :  { %p3101_p1 = pnand %p3100_p0, %p3094_p11 }
  0x21   :  { %3104 = shalt.err (!%p3101_p1)
}
  0x22   :  { %22 = dma.hbm_to_vmem [thread:$0]  %s4907_s0, 128, %s3186_s15, [#allocation4], %s3157_s24, %s3157_s24, %s3158_s25  }
  0x23   :  { %s3159_s10 = smov [#allocation8]   ;;  %s3105_s14 = scalar_lea.hbm %s4909_s2, 256 }
  0x24   :  { %s40_s11 = sshll.u32 %s3159_s10, 4  ;;  %p3106_p2 = scmp.ne.s32.totalorder %s4909_s2, %s3105_s14  ;;  %s41_s11 = int_to_ptr.vmem [resolvable:$true] %s40_s11 }
  0x25   :  { %p3109_p3 = scmp.lt.u32.totalorder %s3105_s14, %s4909_s2 }
  0x27   :  { %p3111_p4 = pnand %p3109_p3, %p3106_p2 }
  0x29   :  { %3114 = shalt.err (!%p3111_p4)
}
  0x2a   :  { %s3115_s20 = scalar_lea.vmem %s41_s11, 256  ;;  %p3120_p6 = scmp.lt.s32.totalorder %s41_s11, %s41_s11 }
  0x2b   :  { %p3116_p5 = scmp.ne.s32.totalorder %s41_s11, %s3115_s20  ;;  %p3121_p7 = scmp.lt.s32.totalorder %s3115_s20, %s3115_s20 }
  0x2d   :  { %p3122_p8 = por %p3121_p7, %p3120_p6 }
  0x2f   :  { %p3123_p9 = pnand %p3122_p8, %p3116_p5 }
  0x31   :  { %3126 = shalt.err (!%p3123_p9)
}
  0x32   :  { %s3160_s0 = smov 128   ;;  %s3161_s15 = smov 8  }
  0x33   :  { %46 = dma.hbm_to_vmem [thread:$0]  %s4909_s2, 256, %s41_s11, [#allocation7], %s3160_s0, %s3160_s0, %s3161_s15  }
  0x34   :  { %3149 = dma.done.wait [#allocation4], 128  }
  0x35   :  { %3150 = vsyncadd [#allocation4], 4294967168 }
  0x36   :  { %3151 = dma.done.wait [#allocation7], 384  }
  0x37   :  { %3152 = vsyncadd [#allocation7], 4294966912  ;;  %v4911_v0 = vlaneseq  ;;  %v93_v5 = vld [vmem:[#allocation3] sm:$0x3]  ;;  %v359_v6 = vld [vmem:[#allocation3 + $0x2] sm:$0x3] }
  0x38   :  { %v3162_v13 = vmov 1.0|1.0   ;;  %v3539_v32 = vld [vmem:[#allocation8] sm:$0xff]  ;;  %v3606_v37 = vld [vmem:[#allocation8 + $0x8] sm:$0xff]  ;;  %v626_v41 = vld [vmem:[#allocation3 + $0x4] sm:$0x3] }
  0x39   :  { %v3233_v1 = vshrl.u32 %v4911_v0, 7  ;;  %4946 = vst [vmem:[#allocation19_spill] sm:$0xff] %v3539_v32  ;;  %4952 = vst [vmem:[#allocation23_spill] sm:$0xff] %v3606_v37  ;;  %s3165_s2 = smov [#allocation9]  }
  0x3a   :  { %s2515_s23 = sshll.u32 %s3165_s2, 4  ;;  %s2516_s23 = int_to_ptr.vmem [resolvable:$true] %s2515_s23 }
  0x3b   :  { %v3236_v2 = vsub.s32 1, %v3233_v1  ;;  %v3239_v3 = vsub.s32 0, %v3233_v1  ;;  %v3242_v4 = vadd.s32 8, %v3233_v1  ;;  %v3245_v7 = vadd.s32 16, %v3233_v1  ;;  %s3127_s24 = scalar_lea.vmem %s2516_s23, 256  ;;  %p3132_p11 = scmp.lt.s32.totalorder %s2516_s23, %s2516_s23 }
  0x3c   :  { %v3248_v8 = vadd.s32 24, %v3233_v1  ;;  %v3284_v14 = vadd.s32 32, %v3233_v1  ;;  %v3287_v15 = vadd.s32 40, %v3233_v1  ;;  %v3310_v16 = vadd.s32 48, %v3233_v1  ;;  %p3128_p10 = scmp.ne.s32.totalorder %s2516_s23, %s3127_s24  ;;  %p3133_p12 = scmp.lt.s32.totalorder %s3127_s24, %s3127_s24 }
  0x3d   :  { %v3251_v9 = vrot.slane %v93_v5, %v3236_v2  ;;  %v3254_v10 = vrot.slane %v359_v6, %v3236_v2  ;;  %v3257_v11 = vrot.slane %v93_v5, %v3239_v3  ;;  %v3260_v12 = vrot.slane %v359_v6, %v3239_v3 }
  0x3e   :  { %v3313_v17 = vadd.s32 56, %v3233_v1  ;;  %v3336_v18 = vadd.s32 64, %v3233_v1  ;;  %v3339_v19 = vadd.s32 72, %v3233_v1  ;;  %v3362_v20 = vadd.s32 80, %v3233_v1  ;;  %p3134_p13 = por %p3133_p12, %p3132_p11 }
  0x3f   :  { %vm103_vm0 = vcmp.eq.s32.totalorder %v3233_v1, %v3251_v9  ;;  %vm105_vm1 = vcmp.eq.s32.totalorder %v3242_v4, %v3251_v9  ;;  %vm369_vm2 = vcmp.eq.s32.totalorder %v3233_v1, %v3254_v10  ;;  %vm371_vm3 = vcmp.eq.s32.totalorder %v3242_v4, %v3254_v10 }
  0x40   :  { %vm2792_vm4 = vmpackc.low %vm105_vm1, %vm103_vm0  ;;  %vm102_vm5 = vcmp.eq.s32.totalorder %v3233_v1, %v3257_v11  ;;  %vm104_vm6 = vcmp.eq.s32.totalorder %v3242_v4, %v3257_v11  ;;  %vm368_vm7 = vcmp.eq.s32.totalorder %v3233_v1, %v3260_v12  ;;  %vm370_vm8 = vcmp.eq.s32.totalorder %v3242_v4, %v3260_v12  ;;  %p3135_p0 = pnand %p3134_p13, %p3128_p10 }
  0x41   :  { %2793 = vmatprep.subr.msk.bf16.mxu0 %vm2792_vm4, %v3162_v13  ;;  %vm2856_vm9 = vmpackc.low %vm371_vm3, %vm369_vm2  ;;  %vm107_vm10 = vcmp.eq.s32.totalorder %v3245_v7, %v3251_v9  ;;  %vm109_vm11 = vcmp.eq.s32.totalorder %v3248_v8, %v3251_v9  ;;  %vm373_vm13 = vcmp.eq.s32.totalorder %v3245_v7, %v3254_v10  ;;  %vm375_vm14 = vcmp.eq.s32.totalorder %v3248_v8, %v3254_v10 }
  0x42   :  { %2857 = vmatprep.subr.msk.bf16.mxu1 %vm2856_vm9, %v3162_v13  ;;  %vm2794_vm12 = vmpackc.low %vm104_vm6, %vm102_vm5  ;;  %vm106_vm0 = vcmp.eq.s32.totalorder %v3245_v7, %v3257_v11  ;;  %vm108_vm1 = vcmp.eq.s32.totalorder %v3248_v8, %v3257_v11  ;;  %vm372_vm3 = vcmp.eq.s32.totalorder %v3245_v7, %v3260_v12  ;;  %vm374_vm4 = vcmp.eq.s32.totalorder %v3248_v8, %v3260_v12 }
  0x43   :  { %2795 = vmatpush1.bf16.msk.msra.mxu0 %vm2794_vm12, %v3162_v13  ;;  %vm2858_vm15 = vmpackc.low %vm370_vm8, %vm368_vm7  ;;  %vm111_vm6 = vcmp.eq.s32.totalorder %v3284_v14, %v3251_v9  ;;  %vm113_vm7 = vcmp.eq.s32.totalorder %v3287_v15, %v3251_v9  ;;  %vm377_vm9 = vcmp.eq.s32.totalorder %v3284_v14, %v3254_v10  ;;  %vm110_vm12 = vcmp.eq.s32.totalorder %v3284_v14, %v3257_v11 }
  0x44   :  { %2859 = vmatpush1.bf16.msk.msra.mxu1 %vm2858_vm15, %v3162_v13  ;;  %vm2796_vm2 = vmpackc.low %vm109_vm11, %vm107_vm10  ;;  %vm379_vm10 = vcmp.eq.s32.totalorder %v3287_v15, %v3254_v10  ;;  %vm376_vm15 = vcmp.eq.s32.totalorder %v3284_v14, %v3260_v12  ;;  %v3365_v21 = vadd.s32 88, %v3233_v1  ;;  %v3388_v22 = vadd.s32 96, %v3233_v1 }
  0x45   :  { %2797 = vmatprep.subr.msk.bf16.mxu0 %vm2796_vm2, %v3162_v13  ;;  %vm2860_vm5 = vmpackc.low %vm375_vm14, %vm373_vm13  ;;  %vm112_vm13 = vcmp.eq.s32.totalorder %v3287_v15, %v3257_v11  ;;  %vm115_vm2 = vcmp.eq.s32.totalorder %v3310_v16, %v3251_v9  ;;  %v3391_v23 = vadd.s32 104, %v3233_v1  ;;  %v3404_v24 = vadd.s32 112, %v3233_v1 }
  0x46   :  { %2861 = vmatprep.subr.msk.bf16.mxu1 %vm2860_vm5, %v3162_v13  ;;  %vm2798_vm8 = vmpackc.low %vm108_vm1, %vm106_vm0  ;;  %vm378_vm0 = vcmp.eq.s32.totalorder %v3287_v15, %v3260_v12  ;;  %vm381_vm5 = vcmp.eq.s32.totalorder %v3310_v16, %v3254_v10  ;;  %v3407_v25 = vadd.s32 120, %v3233_v1  ;;  %v3418_v26 = vadd.s32 128, %v3233_v1 }
  0x47   :  { %2799 = vmatpush1.bf16.msk.msra.mxu0 %vm2798_vm8, %v3162_v13  ;;  %vm2862_vm11 = vmpackc.low %vm374_vm4, %vm372_vm3  ;;  %vm117_vm3 = vcmp.eq.s32.totalorder %v3313_v17, %v3251_v9  ;;  %vm114_vm8 = vcmp.eq.s32.totalorder %v3310_v16, %v3257_v11  ;;  %v3458_v27 = vadd.s32 136, %v3233_v1  ;;  %v3472_v28 = vadd.s32 144, %v3233_v1 }
  0x48   :  { %2863 = vmatpush1.bf16.msk.msra.mxu1 %vm2862_vm11, %v3162_v13  ;;  %vm2800_vm14 = vmpackc.low %vm113_vm7, %vm111_vm6  ;;  %vm383_vm6 = vcmp.eq.s32.totalorder %v3313_v17, %v3254_v10  ;;  %vm380_vm11 = vcmp.eq.s32.totalorder %v3310_v16, %v3260_v12  ;;  %4940 = vst [vmem:[#allocation13_spill] sm:$0xff] %v3418_v26  ;;  %v3475_v29 = vadd.s32 152, %v3233_v1  ;;  %v3506_v30 = vadd.s32 160, %v3233_v1 }
  0x49   :  { %2801 = vmatprep.subr.msk.bf16.mxu0 %vm2800_vm14, %v3162_v13  ;;  %vm2864_vm1 = vmpackc.low %vm379_vm10, %vm377_vm9  ;;  %vm116_vm9 = vcmp.eq.s32.totalorder %v3313_v17, %v3257_v11  ;;  %vm119_vm14 = vcmp.eq.s32.totalorder %v3336_v18, %v3251_v9  ;;  %4941 = vst [vmem:[#allocation14_spill] sm:$0xff] %v3458_v27  ;;  %v3537_v31 = vadd.s32 168, %v3233_v1  ;;  %v3553_v33 = vadd.s32 176, %v3233_v1 }
  0x4a   :  { %2865 = vmatprep.subr.msk.bf16.mxu1 %vm2864_vm1, %v3162_v13  ;;  %vm2802_vm4 = vmpackc.low %vm112_vm13, %vm110_vm12  ;;  %vm382_vm12 = vcmp.eq.s32.totalorder %v3313_v17, %v3260_v12  ;;  %vm385_vm1 = vcmp.eq.s32.totalorder %v3336_v18, %v3254_v10  ;;  %4942 = vst [vmem:[#allocation15_spill] sm:$0xff] %v3472_v28  ;;  %v3556_v34 = vadd.s32 184, %v3233_v1  ;;  %v3585_v35 = vadd.s32 192, %v3233_v1 }
  0x4b   :  { %2803 = vmatpush1.bf16.msk.msra.mxu0 %vm2802_vm4, %v3162_v13  ;;  %vm2866_vm7 = vmpackc.low %vm378_vm0, %vm376_vm15  ;;  %vm121_vm15 = vcmp.eq.s32.totalorder %v3339_v19, %v3251_v9  ;;  %vm118_vm4 = vcmp.eq.s32.totalorder %v3336_v18, %v3257_v11  ;;  %4943 = vst [vmem:[#allocation16_spill] sm:$0xff] %v3475_v29  ;;  %v1170_v36 = vrot.slane %v3539_v32, %v3239_v3  ;;  %v3620_v38 = vadd.s32 200, %v3233_v1 }
  0x4c   :  { %2867 = vmatpush1.bf16.msk.msra.mxu1 %vm2866_vm7, %v3162_v13  ;;  %vm2804_vm10 = vmpackc.low %vm117_vm3, %vm115_vm2  ;;  %vm387_vm2 = vcmp.eq.s32.totalorder %v3339_v19, %v3254_v10  ;;  %vm384_vm7 = vcmp.eq.s32.totalorder %v3336_v18, %v3260_v12  ;;  %4944 = vst [vmem:[#allocation17_spill] sm:$0xff] %v3506_v30  ;;  %v3623_v39 = vadd.s32 208, %v3233_v1  ;;  %v3626_v40 = vadd.s32 216, %v3233_v1 }
  0x4d   :  { %2805 = vmatprep.subr.msk.bf16.mxu0 %vm2804_vm10, %v3162_v13  ;;  %vm2868_vm13 = vmpackc.low %vm383_vm6, %vm381_vm5  ;;  %vm120_vm5 = vcmp.eq.s32.totalorder %v3339_v19, %v3257_v11  ;;  %vm123_vm10 = vcmp.eq.s32.totalorder %v3362_v20, %v3251_v9  ;;  %4945 = vst [vmem:[#allocation18_spill] sm:$0xff] %v3537_v31  ;;  %v3640_v42 = vadd.s32 224, %v3233_v1  ;;  %v3643_v43 = vadd.s32 232, %v3233_v1 }
  0x4e   :  { %2869 = vmatprep.subr.msk.bf16.mxu1 %vm2868_vm13, %v3162_v13  ;;  %vm2806_vm0 = vmpackc.low %vm116_vm9, %vm114_vm8  ;;  %vm386_vm8 = vcmp.eq.s32.totalorder %v3339_v19, %v3260_v12  ;;  %vm389_vm13 = vcmp.eq.s32.totalorder %v3362_v20, %v3254_v10  ;;  %4947 = vst [vmem:[#allocation20_spill] sm:$0xff] %v3553_v33  ;;  %v3646_v44 = vadd.s32 240, %v3233_v1  ;;  %v3649_v45 = vadd.s32 248, %v3233_v1 }
  0x4f   :  { %2807 = vmatpush1.bf16.msk.msra.mxu0 %vm2806_vm0, %v3162_v13  ;;  %vm2870_vm3 = vmpackc.low %vm382_vm12, %vm380_vm11  ;;  %vm125_vm11 = vcmp.eq.s32.totalorder %v3365_v21, %v3251_v9  ;;  %vm122_vm0 = vcmp.eq.s32.totalorder %v3362_v20, %v3257_v11  ;;  %4948 = vst [vmem:[#allocation21_spill] sm:$0xff] %v3556_v34  ;;  %v3663_v46 = vsub.s32 4, %v3233_v1  ;;  %v1178_v47 = vrot.slane %v3606_v37, %v3239_v3 }
  0x50   :  { %2871 = vmatpush1.bf16.msk.msra.mxu1 %vm2870_vm3, %v3162_v13  ;;  %vm2808_vm6 = vmpackc.low %vm121_vm15, %vm119_vm14  ;;  %vm391_vm14 = vcmp.eq.s32.totalorder %v3365_v21, %v3254_v10  ;;  %vm388_vm3 = vcmp.eq.s32.totalorder %v3362_v20, %v3260_v12  ;;  %4951 = vst [vmem:[#allocation22_spill] sm:$0xff] %v3585_v35  ;;  %v3667_v48 = vpack.c.bf16 %v1170_v36, %v1170_v36  ;;  %v3683_v50 = vsub.s32 5, %v3233_v1 }
  0x51   :  { %2809 = vmatprep.subr.msk.bf16.mxu0 %vm2808_vm6, %v3162_v13  ;;  %vm2872_vm9 = vmpackc.low %vm387_vm2, %vm385_vm1  ;;  %vm124_vm1 = vcmp.eq.s32.totalorder %v3365_v21, %v3257_v11  ;;  %vm127_vm6 = vcmp.eq.s32.totalorder %v3388_v22, %v3251_v9  ;;  %4953 = vst [vmem:[#allocation24_spill] sm:$0xff] %v3620_v38  ;;  %v1508_v49 = vrot.slane %v3539_v32, %v3236_v2 }
  0x52   :  { %2873 = vmatprep.subr.msk.bf16.mxu1 %vm2872_vm9, %v3162_v13  ;;  %vm2810_vm12 = vmpackc.low %vm120_vm5, %vm118_vm4  ;;  %vm390_vm4 = vcmp.eq.s32.totalorder %v3365_v21, %v3260_v12  ;;  %vm395_vm9 = vcmp.eq.s32.totalorder %v3391_v23, %v3254_v10  ;;  %v1516_v51 = vrot.slane %v3606_v37, %v3236_v2  ;;  %v3688_v52 = vrot.slane %v626_v41, %v3239_v3 }
  0x53   :  { %2811 = vmatpush1.bf16.msk.msra.mxu0 %vm2810_vm12, %v3162_v13  ;;  %vm2874_vm15 = vmpackc.low %vm386_vm8, %vm384_vm7  ;;  %vm129_vm7 = vcmp.eq.s32.totalorder %v3391_v23, %v3251_v9  ;;  %vm393_vm8 = vcmp.eq.s32.totalorder %v3388_v22, %v3254_v10  ;;  %vm128_vm12 = vcmp.eq.s32.totalorder %v3391_v23, %v3257_v11  ;;  %v3691_v53 = vrot.slane %v626_v41, %v3236_v2 }
  0x54   :  { %2875 = vmatpush1.bf16.msk.msra.mxu1 %vm2874_vm15, %v3162_v13  ;;  %vm2812_vm2 = vmpackc.low %vm125_vm11, %vm123_vm10  ;;  %vm126_vm11 = vcmp.eq.s32.totalorder %v3388_v22, %v3257_v11  ;;  %v1174_v54 = vrot.slane %v3539_v32, %v3663_v46  ;;  %v1182_v55 = vrot.slane %v3606_v37, %v3663_v46  ;;  %v3708_v56 = vpack.c.bf16 %v1178_v47, %v1178_v47 }
  0x55   :  { %2813 = vmatprep.subr.msk.bf16.mxu0 %vm2812_vm2, %v3162_v13  ;;  %vm2876_vm5 = vmpackc.low %vm391_vm14, %vm389_vm13  ;;  %vm392_vm13 = vcmp.eq.s32.totalorder %v3388_v22, %v3260_v12  ;;  %vm394_vm14 = vcmp.eq.s32.totalorder %v3391_v23, %v3260_v12  ;;  %vm397_vm2 = vcmp.eq.s32.totalorder %v3404_v24, %v3254_v10  ;;  %v1191_v57 = vunpack.c.l.bf16 %v3667_v48 }
  0x56   :  { %2877 = vmatprep.subr.msk.bf16.mxu1 %vm2876_vm5, %v3162_v13  ;;  %vm2814_vm10 = vmpackc.low %vm124_vm1, %vm122_vm0  ;;  %vm131_vm0 = vcmp.eq.s32.totalorder %v3404_v24, %v3251_v9  ;;  %vm133_vm1 = vcmp.eq.s32.totalorder %v3407_v25, %v3251_v9  ;;  %vm135_vm5 = vcmp.eq.s32.totalorder %v3418_v26, %v3251_v9  ;;  %v1512_v58 = vrot.slane %v3539_v32, %v3683_v50 }
  0x57   :  { %2815 = vmatpush1.bf16.msk.msra.mxu0 %vm2814_vm10, %v3162_v13  ;;  %vm2878_vm15 = vmpackc.low %vm390_vm4, %vm388_vm3  ;;  %vm399_vm4 = vcmp.eq.s32.totalorder %v3407_v25, %v3254_v10  ;;  %vm396_vm10 = vcmp.eq.s32.totalorder %v3404_v24, %v3260_v12  ;;  %v1520_v59 = vrot.slane %v3606_v37, %v3683_v50  ;;  %v3726_v60 = vpack.c.bf16 %v1508_v49, %v1508_v49 }
  0x58   :  { %2879 = vmatpush1.bf16.msk.msra.mxu1 %vm2878_vm15, %v3162_v13  ;;  %vm2816_vm3 = vmpackc.low %vm129_vm7, %vm127_vm6  ;;  %vm132_vm7 = vcmp.eq.s32.totalorder %v3407_v25, %v3257_v11  ;;  %vm143_vm15 = vcmp.eq.s32.totalorder %v3506_v30, %v3251_v9  ;;  %v3728_v61 = vpack.c.bf16 %v1516_v51, %v1516_v51  ;;  %v1188_v62 = vpack.c.bf16 %v1174_v54, %v1174_v54 }
  0x59   :  { %2817 = vmatprep.subr.msk.bf16.mxu0 %vm2816_vm3, %v3162_v13  ;;  %vm2880_vm6 = vmpackc.low %vm395_vm9, %vm393_vm8  ;;  %vm401_vm9 = vcmp.eq.s32.totalorder %v3418_v26, %v3254_v10  ;;  %vm402_vm3 = vcmp.eq.s32.totalorder %v3458_v27, %v3260_v12  ;;  %v1190_v63 = vpack.c.bf16 %v1182_v55, %v1182_v55  ;;  %v1193_v5 = vunpack.c.l.bf16 %v3708_v56 }
  0x5a   :  { %2881 = vmatprep.subr.msk.bf16.mxu1 %vm2880_vm6, %v3162_v13  ;;  %vm2818_vm8 = vmpackc.low %vm128_vm12, %vm126_vm11  ;;  %vm137_vm12 = vcmp.eq.s32.totalorder %v3458_v27, %v3251_v9  ;;  %vm403_vm6 = vcmp.eq.s32.totalorder %v3458_v27, %v3254_v10  ;;  %v1526_v36 = vpack.c.bf16 %v1512_v58, %v1512_v58  ;;  %v1528_v41 = vpack.c.bf16 %v1520_v59, %v1520_v59 }
  0x5b   :  { %2819 = vmatpush1.bf16.msk.msra.mxu0 %vm2818_vm8, %v3162_v13  ;;  %vm2882_vm11 = vmpackc.low %vm394_vm14, %vm392_vm13  ;;  %vm139_vm14 = vcmp.eq.s32.totalorder %v3472_v28, %v3251_v9  ;;  %vm141_vm8 = vcmp.eq.s32.totalorder %v3475_v29, %v3251_v9  ;;  %v1529_v47 = vunpack.c.l.bf16 %v3726_v60  ;;  %v1531_v49 = vunpack.c.l.bf16 %v3728_v61 }
  0x5c   :  { %2883 = vmatpush1.bf16.msk.msra.mxu1 %vm2882_vm11, %v3162_v13  ;;  %vm2820_vm13 = vmpackc.low %vm133_vm1, %vm131_vm0  ;;  %vm406_vm1 = vcmp.eq.s32.totalorder %v3475_v29, %v3260_v12  ;;  %vm144_vm11 = vcmp.eq.s32.totalorder %v3537_v31, %v3257_v11  ;;  %v1192_v51 = vunpack.c.l.bf16 %v1188_v62  ;;  %v1194_v54 = vunpack.c.l.bf16 %v1190_v63 }
  0x5d   :  { %2821 = vmatprep.subr.msk.bf16.mxu0 %vm2820_vm13, %v3162_v13  ;;  %vm2884_vm0 = vmpackc.low %vm399_vm4, %vm397_vm2  ;;  %vm4949_vm13 = vcmp.eq.s32.totalorder %v3404_v24, %v3257_v11  ;;  %vm140_vm4 = vcmp.eq.s32.totalorder %v3475_v29, %v3257_v11  ;;  %v1276_v55 = vunpack.c.l.b16 %v1188_v62  ;;  %v1278_v58 = vunpack.c.l.b16 %v1190_v63 }
  0x5e   :  { %2885 = vmatprep.subr.msk.bf16.mxu1 %vm2884_vm0, %v3162_v13  ;;  %vm2822_vm2 = vmpackc.low %vm132_vm7, %vm4949_vm13  ;;  %vm4950_vm7 = vcmp.eq.s32.totalorder %v3407_v25, %v3260_v12  ;;  %vm148_vm13 = vcmp.eq.s32.totalorder %v3556_v34, %v3257_v11  ;;  %v1530_v59 = vunpack.c.l.bf16 %v1526_v36  ;;  %v1532_v0 = vunpack.c.l.bf16 %v1528_v41 }
  0x5f   :  { %2823 = vmatpush1.bf16.msk.msra.mxu0 %vm2822_vm2, %v3162_v13  ;;  %vm2886_vm0 = vmpackc.low %vm4950_vm7, %vm396_vm10  ;;  %vm145_vm2 = vcmp.eq.s32.totalorder %v3537_v31, %v3251_v9  ;;  %vm411_vm7 = vcmp.eq.s32.totalorder %v3537_v31, %v3254_v10  ;;  %v1614_v6 = vunpack.c.l.b16 %v1526_v36  ;;  %v1616_v62 = vunpack.c.l.b16 %v1528_v41 }
  0x60   :  { %2887 = vmatpush1.bf16.msk.msra.mxu1 %vm2886_vm0, %v3162_v13  ;;  %vm2824_vm10 = vmpackc.low %vm137_vm12, %vm135_vm5  ;;  %vm410_vm0 = vcmp.eq.s32.totalorder %v3537_v31, %v3260_v12  ;;  %vm146_vm12 = vcmp.eq.s32.totalorder %v3553_v33, %v3257_v11  ;;  %v1199_v63 = vcombine.low %v1191_v57, %v1192_v51  ;;  %v1277_v36 = vunpack.c.l.b16 %v3708_v56 }
  0x61   :  { %2825 = vmatprep.subr.msk.bf16.mxu0 %vm2824_vm10, %v3162_v13  ;;  %vm2888_vm5 = vmpackc.low %vm403_vm6, %vm401_vm9  ;;  %vm4954_vm9 = vcmp.eq.s32.totalorder %v3418_v26, %v3257_v11  ;;  %vm4955_vm6 = vcmp.eq.s32.totalorder %v3458_v27, %v3257_v11  ;;  %v1537_v57 = vcombine.low %v1529_v47, %v1530_v59  ;;  %v1619_v41 = vrot.slane %v1614_v6, 1 }
  0x62   :  { %2889 = vmatprep.subr.msk.bf16.mxu1 %vm2888_vm5, %v3162_v13  ;;  %vm2826_vm10 = vmpackc.low %vm4955_vm6, %vm4954_vm9  ;;  %vm4939_vm5 = vcmask 1041409   ;;  %vm4956_vm9 = vcmp.eq.s32.totalorder %v3418_v26, %v3260_v12 }
  0x63   :  { %2827 = vmatpush1.bf16.msk.msra.mxu0 %vm2826_vm10, %v3162_v13  ;;  %vm2890_vm6 = vmpackc.low %vm402_vm3, %vm4956_vm9  ;;  %vm151_vm9 = vcmp.eq.s32.totalorder %v3585_v35, %v3251_v9  ;;  %vm152_vm10 = vcmp.eq.s32.totalorder %v3620_v38, %v3257_v11 }
  0x64   :  { %2891 = vmatpush1.bf16.msk.msra.mxu1 %vm2890_vm6, %v3162_v13  ;;  %vm2828_vm3 = vmpackc.low %vm141_vm8, %vm139_vm14  ;;  %vm4957_vm14 = vcmp.eq.s32.totalorder %v3472_v28, %v3254_v10  ;;  %vm4958_vm8 = vcmp.eq.s32.totalorder %v3475_v29, %v3254_v10  ;;  %v1200_v29 = vcombine.low %v1193_v5, %v1194_v54  ;;  %v1538_v5 = vcombine.low %v1531_v49, %v1532_v0 }
  0x65   :  { %2829 = vmatprep.subr.msk.bf16.mxu0 %vm2828_vm3, %v3162_v13  ;;  %vm2892_vm6 = vmpackc.low %vm4958_vm8, %vm4957_vm14  ;;  %vm4959_vm3 = vcmp.eq.s32.totalorder %v3472_v28, %v3257_v11  ;;  %vm417_vm8 = vcmp.eq.s32.totalorder %v3585_v35, %v3254_v10  ;;  %v3814_v0 = vsub.f32 %v3539_v32, %v1199_v63  ;;  %v3822_v49 = vrot.slane %v1277_v36, 7 }
  0x66   :  { %2893 = vmatprep.subr.msk.bf16.mxu1 %vm2892_vm6, %v3162_v13  ;;  %vm2830_vm14 = vmpackc.low %vm140_vm4, %vm4959_vm3  ;;  %vm4960_vm4 = vcmp.eq.s32.totalorder %v3472_v28, %v3260_v12  ;;  %vm150_vm3 = vcmp.eq.s32.totalorder %v3585_v35, %v3257_v11  ;;  %v1282_v28 = vrot.slane %v1278_v58, 7  ;;  %v3817_v6 = vsub.f32 %v3606_v37, %v1200_v29 }
  0x67   :  { %2831 = vmatpush1.bf16.msk.msra.mxu0 %vm2830_vm14, %v3162_v13  ;;  %vm2894_vm6 = vmpackc.low %vm406_vm1, %vm4960_vm4  ;;  %v3838_v29 = vsub.f32 %v3539_v32, %v1537_v57  ;;  %v3841_v51 = vsub.f32 %v3606_v37, %v1538_v5  ;;  %v3844_v54 = vsel %vm4939_vm5, %v1616_v62, %v1619_v41  ;;  %v1214_v58 = vrot.slane %v3814_v0, %v3663_v46 }
  0x68   :  { %2895 = vmatpush1.bf16.msk.msra.mxu1 %vm2894_vm6, %v3162_v13  ;;  %vm2832_vm1 = vmpackc.low %vm145_vm2, %vm143_vm15  ;;  %vm4961_vm6 = vcmp.eq.s32.totalorder %v3506_v30, %v3254_v10  ;;  %vm155_vm2 = vcmp.eq.s32.totalorder %v3623_v39, %v3251_v9  ;;  %v3820_v47 = vsel %vm4939_vm5, %v1282_v28, %v1276_v55  ;;  %v1210_v55 = vrot.slane %v3814_v0, %v3239_v3 }
  0x69   :  { %2833 = vmatprep.subr.msk.bf16.mxu0 %vm2832_vm1, %v3162_v13  ;;  %vm2896_vm15 = vmpackc.low %vm411_vm7, %vm4961_vm6  ;;  %vm4962_vm1 = vcmp.eq.s32.totalorder %v3506_v30, %v3257_v11  ;;  %vm421_vm7 = vcmp.eq.s32.totalorder %v3623_v39, %v3254_v10  ;;  %vm4965_vm6 = vcmp.eq.s32.totalorder %v3556_v34, %v3251_v9  ;;  %v1218_v59 = vrot.slane %v3817_v6, %v3239_v3 }
  0x6a   :  { %2897 = vmatprep.subr.msk.bf16.mxu1 %vm2896_vm15, %v3162_v13  ;;  %vm2834_vm14 = vmpackc.low %vm144_vm11, %vm4962_vm1  ;;  %vm4963_vm15 = vcmp.eq.s32.totalorder %v3506_v30, %v3260_v12  ;;  %vm4967_vm11 = vcmp.eq.s32.totalorder %v3556_v34, %v3254_v10  ;;  %v1222_v62 = vrot.slane %v3817_v6, %v3663_v46  ;;  %v1548_v63 = vrot.slane %v3838_v29, %v3236_v2 }
  0x6b   :  { %2835 = vmatpush1.bf16.msk.msra.mxu0 %vm2834_vm14, %v3162_v13  ;;  %vm2898_vm4 = vmpackc.low %vm410_vm0, %vm4963_vm15  ;;  %vm4964_vm14 = vcmp.eq.s32.totalorder %v3553_v33, %v3251_v9  ;;  %vm420_vm15 = vcmp.eq.s32.totalorder %v3623_v39, %v3260_v12  ;;  %v1552_v36 = vrot.slane %v3838_v29, %v3683_v50  ;;  %v1556_v57 = vrot.slane %v3841_v51, %v3236_v2 }
  0x6c   :  { %2899 = vmatpush1.bf16.msk.msra.mxu1 %vm2898_vm4, %v3162_v13  ;;  %vm2836_vm0 = vmpackc.low %vm4965_vm6, %vm4964_vm14  ;;  %vm4966_vm4 = vcmp.eq.s32.totalorder %v3553_v33, %v3254_v10  ;;  %vm159_vm14 = vcmp.eq.s32.totalorder %v3640_v42, %v3251_v9  ;;  %v1560_v5 = vrot.slane %v3841_v51, %v3683_v50  ;;  %vm165_vm1 = vcmp.eq.s32.totalorder %v3649_v45, %v3251_v9 }
  0x6d   :  { %2837 = vmatprep.subr.msk.bf16.mxu0 %vm2836_vm0, %v3162_v13  ;;  %vm2900_vm6 = vmpackc.low %vm4967_vm11, %vm4966_vm4  ;;  %vm4938_vm0 = vcmask 1043459   ;;  %vm426_vm4 = vcmp.eq.s32.totalorder %v3643_v43, %v3260_v12  ;;  %v3895_v41 = vpack.c.bf16 %v1210_v55, %v1210_v55  ;;  %v1228_v56 = vpack.c.bf16 %v1214_v58, %v1214_v58 }
  0x6e   :  { %2901 = vmatprep.subr.msk.bf16.mxu1 %vm2900_vm6, %v3162_v13  ;;  %vm2838_vm11 = vmpackc.low %vm148_vm13, %vm146_vm12  ;;  %vm4968_vm13 = vcmp.eq.s32.totalorder %v3553_v33, %v3260_v12  ;;  %vm4969_vm12 = vcmp.eq.s32.totalorder %v3556_v34, %v3260_v12  ;;  %v3897_v28 = vpack.c.bf16 %v1218_v59, %v1218_v59  ;;  %v1230_v37 = vpack.c.bf16 %v1222_v62, %v1222_v62 }
  0x6f   :  { %2839 = vmatpush1.bf16.msk.msra.mxu0 %vm2838_vm11, %v3162_v13  ;;  %vm2902_vm6 = vmpackc.low %vm4969_vm12, %vm4968_vm13  ;;  %vm4970_vm11 = vcmp.eq.s32.totalorder %v3620_v38, %v3251_v9  ;;  %vm424_vm12 = vcmp.eq.s32.totalorder %v3640_v42, %v3260_v12  ;;  %v3910_v55 = vpack.c.bf16 %v1548_v63, %v1548_v63  ;;  %v1566_v58 = vpack.c.bf16 %v1552_v36, %v1552_v36 }
  0x70   :  { %2903 = vmatpush1.bf16.msk.msra.mxu1 %vm2902_vm6, %v3162_v13  ;;  %vm2840_vm13 = vmpackc.low %vm4970_vm11, %vm151_vm9  ;;  %vm4971_vm9 = vcmp.eq.s32.totalorder %v3620_v38, %v3254_v10  ;;  %vm163_vm11 = vcmp.eq.s32.totalorder %v3646_v44, %v3251_v9  ;;  %v3912_v59 = vpack.c.bf16 %v1556_v57, %v1556_v57  ;;  %v1568_v62 = vpack.c.bf16 %v1560_v5, %v1560_v5 }
  0x71   :  { %2841 = vmatprep.subr.msk.bf16.mxu0 %vm2840_vm13, %v3162_v13  ;;  %vm2904_vm6 = vmpackc.low %vm4971_vm9, %vm417_vm8  ;;  %vm162_vm13 = vcmp.eq.s32.totalorder %v3646_v44, %v3257_v11  ;;  %v1231_v63 = vunpack.c.l.bf16 %v3895_v41  ;;  %v1232_v36 = vunpack.c.l.bf16 %v1228_v56  ;;  %v1233_v57 = vunpack.c.l.bf16 %v3897_v28 }
  0x72   :  { %2905 = vmatprep.subr.msk.bf16.mxu1 %vm2904_vm6, %v3162_v13  ;;  %vm2842_vm8 = vmpackc.low %vm152_vm10, %vm150_vm3  ;;  %vm4972_vm6 = vcmp.eq.s32.totalorder %v3585_v35, %v3260_v12  ;;  %vm4973_vm10 = vcmp.eq.s32.totalorder %v3620_v38, %v3260_v12  ;;  %v1234_v5 = vunpack.c.l.bf16 %v1230_v37  ;;  %v1291_v38 = vunpack.c.l.b16 %v1228_v56 }
  0x73   :  { %2843 = vmatpush1.bf16.msk.msra.mxu0 %vm2842_vm8, %v3162_v13  ;;  %vm2906_vm3 = vmpackc.low %vm4973_vm10, %vm4972_vm6  ;;  %vm4974_vm8 = vcmp.eq.s32.totalorder %v3626_v40, %v3251_v9  ;;  %v1293_v35 = vunpack.c.l.b16 %v1230_v37  ;;  %v1569_v32 = vunpack.c.l.bf16 %v3910_v55  ;;  %v1570_v34 = vunpack.c.l.bf16 %v1566_v58 }
  0x74   :  { %2907 = vmatpush1.bf16.msk.msra.mxu1 %vm2906_vm3, %v3162_v13  ;;  %vm2844_vm6 = vmpackc.low %vm4974_vm8, %vm155_vm2  ;;  %vm4975_vm3 = vcmp.eq.s32.totalorder %v3626_v40, %v3254_v10  ;;  %v1239_v33 = vcombine.low %v1231_v63, %v1232_v36  ;;  %v1240_v31 = vcombine.low %v1233_v57, %v1234_v5  ;;  %v1571_v30 = vunpack.c.l.bf16 %v3912_v59 }
  0x75   :  { %2845 = vmatprep.subr.msk.bf16.mxu0 %vm2844_vm6, %v3162_v13  ;;  %vm2908_vm2 = vmpackc.low %vm4975_vm3, %vm421_vm7  ;;  %v1572_v27 = vunpack.c.l.bf16 %v1568_v62  ;;  %vm4976_vm8 = vcmp.eq.s32.totalorder %v3623_v39, %v3257_v11  ;;  %vm4977_vm6 = vcmp.eq.s32.totalorder %v3626_v40, %v3257_v11  ;;  %v1298_v37 = vrot.slane %v1291_v38, 6 }
  0x76   :  { %2909 = vmatprep.subr.msk.bf16.mxu1 %vm2908_vm2, %v3162_v13  ;;  %vm2846_vm9 = vmpackc.low %vm4977_vm6, %vm4976_vm8  ;;  %v1299_v56 = vrot.slane %v1293_v35, 5  ;;  %vm4937_vm10 = vcmask 1045509   ;;  %v1577_v26 = vcombine.low %v1569_v32, %v1570_v34  ;;  %v1622_v63 = vpack.c.b16 %v3844_v54, %v3844_v54 }
  0x77   :  { %2847 = vmatpush1.bf16.msk.msra.mxu0 %vm2846_vm9, %v3162_v13  ;;  %vm4978_vm7 = vcmp.eq.s32.totalorder %v3626_v40, %v3260_v12  ;;  %v1243_v36 = vsub.f32 %v3814_v0, %v1239_v33  ;;  %v1244_v57 = vsub.f32 %v3817_v6, %v1240_v31  ;;  %v1578_v38 = vcombine.low %v1571_v30, %v1572_v27 }
  0x78   :  { %vm2910_vm3 = vmpackc.low %vm4978_vm7, %vm420_vm15  ;;  %v1628_v35 = vunpack.c.l.b16 %v1566_v58  ;;  %vm4979_vm9 = vcmp.eq.s32.totalorder %v3643_v43, %v3251_v9  ;;  %v1300_v32 = vsel %vm4938_vm0, %v1299_v56, %v1298_v37  ;;  %v1581_v34 = vsub.f32 %v3838_v29, %v1577_v26 }
  0x79   :  { %2911 = vmatpush1.bf16.msk.msra.mxu1 %vm2910_vm3, %v3162_v13  ;;  %vm2848_vm2 = vmpackc.low %vm4979_vm9, %vm159_vm14  ;;  %v1630_v54 = vunpack.c.l.b16 %v1568_v62  ;;  %v4980_v33 = vunpack.c.l.b16 %v3667_v48  ;;  %vm4981_vm15 = vcmp.eq.s32.totalorder %v3640_v42, %v3254_v10  ;;  %vm4982_vm8 = vcmp.eq.s32.totalorder %v3643_v43, %v3254_v10 }
  0x7a   :  { %2849 = vmatprep.subr.msk.bf16.mxu0 %vm2848_vm2, %v3162_v13  ;;  %vm2912_vm14 = vmpackc.low %vm4982_vm8, %vm4981_vm15  ;;  %v1254_v30 = vrot.slane %v1243_v36, %v3663_v46  ;;  %v1262_v26 = vrot.slane %v1244_v57, %v3663_v46  ;;  %v1302_v31 = vpack.c.b16 %v1300_v32, %v1300_v32  ;;  %vm4936_vm6 = vcmask 1041408  }
  0x7b   :  { %v3978_v27 = vsel %vm4939_vm5, %v3822_v49, %v4980_v33  ;;  %v1582_v48 = vsub.f32 %v3841_v51, %v1578_v38  ;;  %2913 = vmatprep.subr.msk.bf16.mxu1 %vm2912_vm14, %v3162_v13  ;;  %vm4983_vm7 = vcmp.eq.s32.totalorder %v3640_v42, %v3257_v11  ;;  %vm4984_vm3 = vcmp.eq.s32.totalorder %v3643_v43, %v3257_v11  ;;  %vm2914_vm2 = vmpackc.low %vm426_vm4, %vm424_vm12 }
  0x7c   :  { %vm2850_vm9 = vmpackc.low %vm4984_vm3, %vm4983_vm7  ;;  %v1592_v0 = vrot.slane %v1581_v34, %v3683_v50  ;;  %v1634_v6 = vrot.slane %v1628_v35, 7  ;;  %v1635_v49 = vrot.slane %v1630_v54, 6  ;;  %v1250_v29 = vrot.slane %v1243_v36, %v3239_v3 }
  0x7d   :  { %2851 = vmatpush1.bf16.msk.msra.mxu0 %vm2850_vm9, %v3162_v13  ;;  %v1268_v46 = vpack.c.bf16 %v1254_v30, %v1254_v30  ;;  %v1270_v51 = vpack.c.bf16 %v1262_v26, %v1262_v26  ;;  %v4985_v58 = vpack.c.b16 %v3820_v47, %v3820_v47  ;;  %vm4986_vm15 = vcmask 1040384   ;;  %2915 = vmatpush1.bf16.msk.msra.mxu1 %vm2914_vm2, %v3162_v13  ;;  %vm2852_vm8 = vmpackc.low %vm165_vm1, %vm163_vm11 }
  0x7e   :  { %v1600_v5 = vrot.slane %v1582_v48, %v3683_v50  ;;  %v1606_v37 = vpack.c.bf16 %v1592_v0, %v1592_v0  ;;  %v1636_v56 = vsel %vm4938_vm0, %v1635_v49, %v1634_v6  ;;  %v1258_v36 = vrot.slane %v1244_v57, %v3239_v3  ;;  %2853 = vmatprep.subr.msk.bf16.mxu0 %vm2852_vm8, %v3162_v13 }
  0x7f   :  { %v1326_v62 = vsel %vm4986_vm15, %v4985_v58, %v1302_v31  ;;  %v1267_v38 = vpack.c.bf16 %v1250_v29, %v1250_v29  ;;  %vm4987_vm4 = vcmp.eq.s32.totalorder %v3646_v44, %v3254_v10  ;;  %vm4988_vm12 = vcmp.eq.s32.totalorder %v3649_v45, %v3254_v10 }
  0x80   :  { %vm2916_vm14 = vmpackc.low %vm4988_vm12, %vm4987_vm4  ;;  %v1308_v50 = vunpack.c.l.b16 %v1268_v46  ;;  %v1310_v47 = vunpack.c.l.b16 %v1270_v51  ;;  %v1608_v35 = vpack.c.bf16 %v1600_v5, %v1600_v5  ;;  %v1638_v9 = vpack.c.b16 %v1636_v56, %v1636_v56 }
  0x81   :  { %2917 = vmatprep.subr.msk.bf16.mxu1 %vm2916_vm14, %v3162_v13  ;;  %vm4989_vm1 = vcmp.eq.s32.totalorder %v3649_v45, %v3257_v11  ;;  %v1644_v57 = vunpack.c.l.b16 %v1606_v37  ;;  %v1269_v32 = vpack.c.bf16 %v1258_v36, %v1258_v36  ;;  %v1284_v54 = vpack.c.b16 %v3978_v27, %v3978_v27 }
  0x82   :  { %vm2854_vm11 = vmpackc.low %vm4989_vm1, %vm162_vm13  ;;  %v1290_v10 = vunpack.c.l.b16 %v3895_v41  ;;  %vm4990_vm7 = vcmp.eq.s32.totalorder %v3646_v44, %v3260_v12  ;;  %vm4991_vm3 = vcmp.eq.s32.totalorder %v3649_v45, %v3260_v12  ;;  %v1315_v33 = vrot.slane %v1308_v50, 4 }
  0x83   :  { %2855 = vmatpush1.bf16.msk.msra.mxu0 %vm2854_vm11, %v3162_v13  ;;  %vm2918_vm9 = vmpackc.low %vm4991_vm3, %vm4990_vm7  ;;  %v1316_v30 = vrot.slane %v1310_v47, 3  ;;  %v1646_v11 = vunpack.c.l.b16 %v1608_v35  ;;  %v1650_v31 = vrot.slane %v1644_v57, 5  ;;  %v1292_v27 = vunpack.c.l.b16 %v3897_v28 }
  0x84   :  { %vm4992_vm13 = vmmov %vm4986_vm15  ;;  %2919 = vmatpush1.bf16.msk.msra.mxu1 %vm2918_vm9, %v3162_v13  ;;  %v1294_v41 = vrot.slane %v1290_v10, 6  ;;  %v1307_v0 = vunpack.c.l.b16 %v1267_v38  ;;  %v1309_v29 = vunpack.c.l.b16 %v1269_v32  ;;  %v1588_v46 = vrot.slane %v1581_v34, %v3236_v2 }
  0x85   :  { %v1660_v26 = vsel %vm4992_vm13, %v1622_v63, %v1638_v9  ;;  %v1317_v6 = vsel %vm4937_vm10, %v1316_v30, %v1315_v33  ;;  %v1651_v49 = vrot.slane %v1646_v11, 4  ;;  %v1295_v51 = vrot.slane %v1292_v27, 5  ;;  %vm4994_vm2 = vmmov %vm4992_vm13 }
  0x86   :  { %v1319_v12 = vpack.c.b16 %v1317_v6, %v1317_v6  ;;  %v1311_v58 = vrot.slane %v1307_v0, 4  ;;  %v1596_v5 = vrot.slane %v1582_v48, %v3236_v2  ;;  %v1312_v37 = vrot.slane %v1309_v29, 3 }
  0x87   :  { %v1652_v63 = vsel %vm4937_vm10, %v1651_v49, %v1650_v31  ;;  %v1605_v56 = vpack.c.bf16 %v1588_v46, %v1588_v46  ;;  %v1615_v36 = vunpack.c.l.b16 %v3728_v61  ;;  %v1297_v50 = vsel %vm4938_vm0, %v1295_v51, %v1294_v41 }
  0x88   :  { %v1332_v28 = vsel %vm4936_vm6, %v1326_v62, %v1319_v12  ;;  %v1654_v38 = vpack.c.b16 %v1652_v63, %v1652_v63  ;;  %v1607_v47 = vpack.c.bf16 %v1596_v5, %v1596_v5  ;;  %v1301_v35 = vpack.c.b16 %v1297_v50, %v1297_v50  ;;  %v893_v62 = vld [vmem:[#allocation3 + $0x6] sm:$0x3] }
  0x89   :  { %1398 = vmatprep.mubr.bf16.mxu0 %v1332_v28  ;;  %v1314_v34 = vsel %vm4937_vm10, %v1312_v37, %v1311_v58  ;;  %v4993_v9 = vunpack.c.l.b16 %v3726_v60  ;;  %v1627_v48 = vunpack.c.l.b16 %v3910_v55  ;;  %v1629_v61 = vunpack.c.l.b16 %v3912_v59  ;;  %v5015_v5 = vld [vmem:[#allocation19_spill] sm:$0xff] }
  0x8a   :  { %v1665_v32 = vsel %vm4936_vm6, %v1660_v26, %v1654_v38  ;;  %v1318_v10 = vpack.c.b16 %v1314_v34, %v1314_v34  ;;  %v1643_v33 = vunpack.c.l.b16 %v1605_v56  ;;  %v1323_v30 = vsel %vm4994_vm2, %v1284_v54, %v1301_v35  ;;  %v5017_v56 = vld [vmem:[#allocation23_spill] sm:$0xff]  ;;  %v5019_v35 = vld [vmem:[#allocation24_spill] sm:$0xff] }
  0x8b   :  { %v1617_v57 = vrot.slane %v4993_v9, 1  ;;  %1732 = vmatprep.mubr.bf16.mxu1 %v1665_v32  ;;  %v1631_v31 = vrot.slane %v1627_v48, 7  ;;  %v1645_v27 = vunpack.c.l.b16 %v1607_v47  ;;  %v1632_v0 = vrot.slane %v1629_v61, 6  ;;  %v5018_v47 = vld [vmem:[#allocation22_spill] sm:$0xff] }
  0x8c   :  { %v1329_v41 = vsel %vm4936_vm6, %v1323_v30, %v1318_v10  ;;  %v1647_v6 = vrot.slane %v1643_v33, 5  ;;  %vm636_vm15 = vcmp.eq.s32.totalorder %v3233_v1, %v3691_v53  ;;  %vm638_vm8 = vcmp.eq.s32.totalorder %v3242_v4, %v3691_v53 }
  0x8d   :  { %v1618_v11 = vsel %vm4939_vm5, %v1615_v36, %v1617_v57  ;;  %1399 = vmatmul.mubr.bf16.vlgmr.msra.gmra.mrb[0].mxu0 %v1329_v41  ;;  %v1648_v55 = vrot.slane %v1645_v27, 4  ;;  %v4068_v59 = vrot.slane %v893_v62, %v3239_v3  ;;  %v1633_v54 = vsel %vm4938_vm0, %v1632_v0, %v1631_v31  ;;  %vm2920_vm4 = vmpackc.low %vm638_vm8, %vm636_vm15 }
  0x8e   :  { %v1621_v60 = vpack.c.b16 %v1618_v11, %v1618_v11  ;;  %v4072_v26 = vrot.slane %v893_v62, %v3236_v2  ;;  %vm635_vm12 = vcmp.eq.s32.totalorder %v3233_v1, %v3688_v52  ;;  %vm637_vm14 = vcmp.eq.s32.totalorder %v3242_v4, %v3688_v52  ;;  %2921 = vmatprep.subr.msk.bf16.mxu0 %vm2920_vm4, %v3162_v13 }
  0x8f   :  { %v1637_v49 = vpack.c.b16 %v1633_v54, %v1633_v54  ;;  %v1649_v29 = vsel %vm4937_vm10, %v1648_v55, %v1647_v6  ;;  %vm2922_vm1 = vmpackc.low %vm637_vm14, %vm635_vm12  ;;  %vm902_vm11 = vcmp.eq.s32.totalorder %v3233_v1, %v4068_v59  ;;  %vm904_vm7 = vcmp.eq.s32.totalorder %v3242_v4, %v4068_v59 }
  0x90   :  { %v1653_v46 = vpack.c.b16 %v1649_v29, %v1649_v29  ;;  %vm903_vm3 = vcmp.eq.s32.totalorder %v3233_v1, %v4072_v26  ;;  %vm905_vm9 = vcmp.eq.s32.totalorder %v3242_v4, %v4072_v26  ;;  %2923 = vmatpush1.bf16.msk.msra.mxu0 %vm2922_vm1, %v3162_v13  ;;  %vm4089_vm13 = vmpackc.low %vm904_vm7, %vm902_vm11  ;;  %vm640_vm2 = vcmp.eq.s32.totalorder %v3245_v7, %v3691_v53 }
  0x91   :  { %vm4997_vm15 = vcmask 1040384   ;;  %vm2984_vm8 = vmpackc.low %vm905_vm9, %vm903_vm3  ;;  %vm642_vm4 = vcmp.eq.s32.totalorder %v3248_v8, %v3691_v53  ;;  %vm907_vm12 = vcmp.eq.s32.totalorder %v3245_v7, %v4072_v26  ;;  %vm909_vm14 = vcmp.eq.s32.totalorder %v3248_v8, %v4072_v26 }
  0x92   :  { %v1657_v51 = vsel %vm4997_vm15, %v1621_v60, %v1637_v49  ;;  %2985 = vmatprep.subr.msk.bf16.mxu1 %vm2984_vm8, %v3162_v13  ;;  %vm2924_vm1 = vmpackc.low %vm642_vm4, %vm640_vm2  ;;  %vm639_vm11 = vcmp.eq.s32.totalorder %v3245_v7, %v3688_v52  ;;  %vm641_vm7 = vcmp.eq.s32.totalorder %v3248_v8, %v3688_v52  ;;  %vm906_vm3 = vcmp.eq.s32.totalorder %v3245_v7, %v4068_v59 }
  0x93   :  { %v1662_v4 = vsel %vm4936_vm6, %v1657_v51, %v1653_v46  ;;  %2925 = vmatprep.subr.msk.bf16.mxu0 %vm2924_vm1, %v3162_v13  ;;  %vm2988_vm9 = vmpackc.low %vm909_vm14, %vm907_vm12  ;;  %vm908_vm15 = vcmp.eq.s32.totalorder %v3248_v8, %v4068_v59  ;;  %vm644_vm8 = vcmp.eq.s32.totalorder %v3284_v14, %v3691_v53  ;;  %vm646_vm2 = vcmp.eq.s32.totalorder %v3287_v15, %v3691_v53 }
  0x94   :  { %1733 = vmatmul.mubr.bf16.vlgmr.msra.gmra.mrb[0].mxu1 %v1662_v4  ;;  %vm2926_vm4 = vmpackc.low %vm641_vm7, %vm639_vm11  ;;  %vm911_vm6 = vcmp.eq.s32.totalorder %v3284_v14, %v4072_v26  ;;  %vm913_vm12 = vcmp.eq.s32.totalorder %v3287_v15, %v4072_v26  ;;  %vm643_vm1 = vcmp.eq.s32.totalorder %v3284_v14, %v3688_v52  ;;  %vm645_vm10 = vcmp.eq.s32.totalorder %v3287_v15, %v3688_v52 }
  0x95   :  { %2987 = vmatpush1.bf16.msk.msra.mxu1 %vm4089_vm13, %v3162_v13  ;;  %2927 = vmatpush1.bf16.msk.msra.mxu0 %vm2926_vm4, %v3162_v13  ;;  %vm2990_vm14 = vmpackc.low %vm908_vm15, %vm906_vm3  ;;  %vm910_vm13 = vcmp.eq.s32.totalorder %v3284_v14, %v4068_v59  ;;  %vm912_vm11 = vcmp.eq.s32.totalorder %v3287_v15, %v4068_v59  ;;  %vm650_vm3 = vcmp.eq.s32.totalorder %v3313_v17, %v3691_v53  ;;  %v4220_v7 = vsub.s32 2, %v3233_v1  ;;  %v5000_v15 = vld [vmem:[#allocation13_spill] sm:$0xff] }
  0x96   :  { %2989 = vmatprep.subr.msk.bf16.mxu1 %vm2988_vm9, %v3162_v13  ;;  %vm2928_vm0 = vmpackc.low %vm646_vm2, %vm644_vm8  ;;  %vm648_vm9 = vcmp.eq.s32.totalorder %v3310_v16, %v3691_v53  ;;  %vm915_vm8 = vcmp.eq.s32.totalorder %v3310_v16, %v4072_v26  ;;  %vm917_vm2 = vcmp.eq.s32.totalorder %v3313_v17, %v4072_v26  ;;  %vm649_vm4 = vcmp.eq.s32.totalorder %v3313_v17, %v3688_v52 }
  0x97   :  { %2929 = vmatprep.subr.msk.bf16.mxu0 %vm2928_vm0, %v3162_v13  ;;  %vm2992_vm7 = vmpackc.low %vm913_vm12, %vm911_vm6  ;;  %vm647_vm6 = vcmp.eq.s32.totalorder %v3310_v16, %v3688_v52  ;;  %v4223_v8 = vsub.s32 6, %v3233_v1  ;;  %vm934_vm5 = vcmp.eq.s32.totalorder %v5000_v15, %v4068_v59  ;;  %v1841_v63 = vrot.slane %v5015_v5, %v4220_v7 }
  0x98   :  { %vm2930_vm15 = vmpackc.low %vm645_vm10, %vm643_vm1  ;;  %vm914_vm10 = vcmp.eq.s32.totalorder %v3310_v16, %v4068_v59  ;;  %v4253_v16 = vsub.s32 3, %v3233_v1  ;;  %v1849_v36 = vrot.slane %v5017_v56, %v4220_v7 }
  0x99   :  { %2991 = vmatpush1.bf16.msk.msra.mxu1 %vm2990_vm14, %v3162_v13  ;;  %2931 = vmatpush1.bf16.msk.msra.mxu0 %vm2930_vm15, %v3162_v13  ;;  %vm2994_vm0 = vmpackc.low %vm912_vm11, %vm910_vm13  ;;  %vm916_vm14 = vcmp.eq.s32.totalorder %v3313_v17, %v4068_v59  ;;  %vm654_vm13 = vcmp.eq.s32.totalorder %v3339_v19, %v3691_v53  ;;  %v5001_v17 = vld [vmem:[#allocation14_spill] sm:$0xff]  ;;  %v1845_v37 = vrot.slane %v5015_v5, %v4223_v8 }
  0x9a   :  { %2993 = vmatprep.subr.msk.bf16.mxu1 %vm2992_vm7, %v3162_v13  ;;  %vm2932_vm12 = vmpackc.low %vm650_vm3, %vm648_vm9  ;;  %vm652_vm7 = vcmp.eq.s32.totalorder %v3336_v18, %v3691_v53  ;;  %vm919_vm9 = vcmp.eq.s32.totalorder %v3336_v18, %v4072_v26  ;;  %vm921_vm3 = vcmp.eq.s32.totalorder %v3339_v19, %v4072_v26  ;;  %v1853_v28 = vrot.slane %v5017_v56, %v4223_v8 }
  0x9b   :  { %2933 = vmatprep.subr.msk.bf16.mxu0 %vm2932_vm12, %v3162_v13  ;;  %vm2996_vm1 = vmpackc.low %vm917_vm2, %vm915_vm8  ;;  %vm651_vm8 = vcmp.eq.s32.totalorder %v3336_v18, %v3688_v52  ;;  %vm653_vm2 = vcmp.eq.s32.totalorder %v3339_v19, %v3688_v52  ;;  %v2176_v38 = vrot.slane %v5015_v5, %v4253_v16  ;;  %v4417_v34 = vpack.c.bf16 %v1841_v63, %v1841_v63 }
  0x9c   :  { %vm2934_vm11 = vmpackc.low %vm649_vm4, %vm647_vm6  ;;  %vm920_vm6 = vcmp.eq.s32.totalorder %v3339_v19, %v4068_v59  ;;  %v5003_v19 = vld [vmem:[#allocation16_spill] sm:$0xff]  ;;  %v1859_v9 = vpack.c.bf16 %v1845_v37, %v1845_v37  ;;  %v2184_v57 = vrot.slane %v5017_v56, %v4253_v16  ;;  %v4436_v32 = vpack.c.bf16 %v1849_v36, %v1849_v36 }
  0x9d   :  { %2995 = vmatpush1.bf16.msk.msra.mxu1 %vm2994_vm0, %v3162_v13  ;;  %2935 = vmatpush1.bf16.msk.msra.mxu0 %vm2934_vm11, %v3162_v13  ;;  %vm2998_vm15 = vmpackc.low %vm916_vm14, %vm914_vm10  ;;  %vm918_vm0 = vcmp.eq.s32.totalorder %v3336_v18, %v4068_v59  ;;  %vm658_vm10 = vcmp.eq.s32.totalorder %v3365_v21, %v3691_v53  ;;  %v5002_v18 = vld [vmem:[#allocation15_spill] sm:$0xff]  ;;  %v1861_v10 = vpack.c.bf16 %v1853_v28, %v1853_v28  ;;  %v1862_v30 = vunpack.c.l.bf16 %v4417_v34 }
  0x9e   :  { %2997 = vmatprep.subr.msk.bf16.mxu1 %vm2996_vm1, %v3162_v13  ;;  %vm2936_vm12 = vmpackc.low %vm654_vm13, %vm652_vm7  ;;  %vm656_vm1 = vcmp.eq.s32.totalorder %v3362_v20, %v3691_v53  ;;  %vm923_vm7 = vcmp.eq.s32.totalorder %v3362_v20, %v4072_v26  ;;  %vm925_vm13 = vcmp.eq.s32.totalorder %v3365_v21, %v4072_v26  ;;  %v4438_v61 = vpack.c.bf16 %v2176_v38, %v2176_v38 }
  0x9f   :  { %2937 = vmatprep.subr.msk.bf16.mxu0 %vm2936_vm12, %v3162_v13  ;;  %vm3000_vm4 = vmpackc.low %vm921_vm3, %vm919_vm9  ;;  %vm655_vm9 = vcmp.eq.s32.totalorder %v3362_v20, %v3688_v52  ;;  %vm657_vm3 = vcmp.eq.s32.totalorder %v3365_v21, %v3688_v52  ;;  %v1863_v11 = vunpack.c.l.bf16 %v1859_v9  ;;  %v1947_v31 = vunpack.c.l.b16 %v1859_v9 }
  0xa0   :  { %vm2938_vm14 = vmpackc.low %vm653_vm2, %vm651_vm8  ;;  %vm924_vm8 = vcmp.eq.s32.totalorder %v3365_v21, %v4068_v59  ;;  %v4320_v21 = vsub.s32 7, %v3233_v1  ;;  %v4459_v27 = vpack.c.bf16 %v2184_v57, %v2184_v57  ;;  %v1864_v41 = vunpack.c.l.bf16 %v4436_v32 }
  0xa1   :  { %2999 = vmatpush1.bf16.msk.msra.mxu1 %vm2998_vm15, %v3162_v13  ;;  %2939 = vmatpush1.bf16.msk.msra.mxu0 %vm2938_vm14, %v3162_v13  ;;  %vm3002_vm11 = vmpackc.low %vm920_vm6, %vm918_vm0  ;;  %vm922_vm15 = vcmp.eq.s32.totalorder %v3362_v20, %v4068_v59  ;;  %vm662_vm0 = vcmp.eq.s32.totalorder %v3391_v23, %v3691_v53  ;;  %v1865_v60 = vunpack.c.l.bf16 %v1861_v10  ;;  %v1949_v0 = vunpack.c.l.b16 %v1861_v10 }
  0xa2   :  { %3001 = vmatprep.subr.msk.bf16.mxu1 %vm3000_vm4, %v3162_v13  ;;  %vm2940_vm12 = vmpackc.low %vm658_vm10, %vm656_vm1  ;;  %vm660_vm4 = vcmp.eq.s32.totalorder %v3388_v22, %v3691_v53  ;;  %vm927_vm1 = vcmp.eq.s32.totalorder %v3388_v22, %v4072_v26  ;;  %vm929_vm10 = vcmp.eq.s32.totalorder %v3391_v23, %v4072_v26  ;;  %v2180_v50 = vrot.slane %v5015_v5, %v4320_v21 }
  0xa3   :  { %2941 = vmatprep.subr.msk.bf16.mxu0 %vm2940_vm12, %v3162_v13  ;;  %vm3004_vm2 = vmpackc.low %vm925_vm13, %vm923_vm7  ;;  %vm659_vm7 = vcmp.eq.s32.totalorder %v3388_v22, %v3688_v52  ;;  %vm661_vm13 = vcmp.eq.s32.totalorder %v3391_v23, %v3688_v52  ;;  %v2188_v48 = vrot.slane %v5017_v56, %v4320_v21  ;;  %v1870_v55 = vcombine.low %v1862_v30, %v1863_v11 }
  0xa4   :  { %vm2942_vm6 = vmpackc.low %vm657_vm3, %vm655_vm9  ;;  %vm928_vm9 = vcmp.eq.s32.totalorder %v3391_v23, %v4068_v59  ;;  %v5007_v23 = vld [vmem:[#allocation18_spill] sm:$0xff]  ;;  %v4440_v33 = vpack.c.bf16 %v2180_v50, %v2180_v50  ;;  %v1953_v54 = vrot.slane %v1947_v31, 2  ;;  %v2197_v49 = vunpack.c.l.bf16 %v4438_v61 }
  0xa5   :  { %3003 = vmatpush1.bf16.msk.msra.mxu1 %vm3002_vm11, %v3162_v13  ;;  %2943 = vmatpush1.bf16.msk.msra.mxu0 %vm2942_vm6, %v3162_v13  ;;  %vm3006_vm14 = vmpackc.low %vm924_vm8, %vm922_vm15  ;;  %vm926_vm11 = vcmp.eq.s32.totalorder %v3388_v22, %v4068_v59  ;;  %vm666_vm15 = vcmp.eq.s32.totalorder %v3407_v25, %v3691_v53  ;;  %vm663_vm6 = vcmp.eq.s32.totalorder %v3404_v24, %v3688_v52  ;;  %v5006_v22 = vld [vmem:[#allocation17_spill] sm:$0xff]  ;;  %v1954_v12 = vrot.slane %v1949_v0, 1 }
  0xa6   :  { %3005 = vmatprep.subr.msk.bf16.mxu1 %vm3004_vm2, %v3162_v13  ;;  %vm2944_vm12 = vmpackc.low %vm662_vm0, %vm660_vm4  ;;  %vm664_vm2 = vcmp.eq.s32.totalorder %v3404_v24, %v3691_v53  ;;  %vm931_vm4 = vcmp.eq.s32.totalorder %v3404_v24, %v4072_v26  ;;  %vm933_vm0 = vcmp.eq.s32.totalorder %v3407_v25, %v4072_v26  ;;  %v2196_v6 = vpack.c.bf16 %v2188_v48, %v2188_v48 }
  0xa7   :  { %2945 = vmatprep.subr.msk.bf16.mxu0 %vm2944_vm12, %v3162_v13  ;;  %vm3008_vm3 = vmpackc.low %vm929_vm10, %vm927_vm1  ;;  %vm665_vm1 = vcmp.eq.s32.totalorder %v3407_v25, %v3688_v52  ;;  %v2198_v29 = vunpack.c.l.bf16 %v4440_v33  ;;  %v1871_v46 = vcombine.low %v1864_v41, %v1865_v60  ;;  %v2199_v51 = vunpack.c.l.bf16 %v4459_v27 }
  0xa8   :  { %vm2946_vm8 = vmpackc.low %vm661_vm13, %vm659_vm7  ;;  %vm932_vm7 = vcmp.eq.s32.totalorder %v3407_v25, %v4068_v59  ;;  %vm668_vm13 = vcmp.eq.s32.totalorder %v5000_v15, %v3691_v53  ;;  %v5011_v25 = vld [vmem:[#allocation21_spill] sm:$0xff]  ;;  %v2200_v4 = vunpack.c.l.bf16 %v2196_v6  ;;  %v2284_v20 = vunpack.c.l.b16 %v2196_v6 }
  0xa9   :  { %3007 = vmatpush1.bf16.msk.msra.mxu1 %vm3006_vm14, %v3162_v13  ;;  %2947 = vmatpush1.bf16.msk.msra.mxu0 %vm2946_vm8, %v3162_v13  ;;  %vm4242_vm10 = vmpackc.low %vm928_vm9, %vm926_vm11  ;;  %vm930_vm14 = vcmp.eq.s32.totalorder %v3404_v24, %v4068_v59  ;;  %vm670_vm11 = vcmp.eq.s32.totalorder %v5001_v17, %v3691_v53  ;;  %vm935_vm9 = vcmp.eq.s32.totalorder %v5000_v15, %v4072_v26  ;;  %v5010_v24 = vld [vmem:[#allocation20_spill] sm:$0xff]  ;;  %v1946_v63 = vunpack.c.l.b16 %v4417_v34 }
  0xaa   :  { %3009 = vmatprep.subr.msk.bf16.mxu1 %vm3008_vm3, %v3162_v13  ;;  %vm2948_vm12 = vmpackc.low %vm666_vm15, %vm664_vm2  ;;  %vm669_vm15 = vcmp.eq.s32.totalorder %v5001_v17, %v3688_v52  ;;  %vm941_vm8 = vcmp.eq.s32.totalorder %v5003_v19, %v4072_v26  ;;  %vm671_vm3 = vcmp.eq.s32.totalorder %v5002_v18, %v3688_v52  ;;  %v2206_v5 = vcombine.low %v2199_v51, %v2200_v4 }
  0xab   :  { %2949 = vmatprep.subr.msk.bf16.mxu0 %vm2948_vm12, %v3162_v13  ;;  %vm3012_vm2 = vmpackc.low %vm933_vm0, %vm931_vm4  ;;  %vm674_vm0 = vcmp.eq.s32.totalorder %v5003_v19, %v3691_v53  ;;  %vm939_vm12 = vcmp.eq.s32.totalorder %v5002_v18, %v4072_v26  ;;  %v1948_v14 = vunpack.c.l.b16 %v4436_v32 }
  0xac   :  { %vm2950_vm4 = vmpackc.low %vm665_vm1, %vm663_vm6  ;;  %vm673_vm1 = vcmp.eq.s32.totalorder %v5003_v19, %v3688_v52 }
  0xad   :  { %3011 = vmatpush1.bf16.msk.msra.mxu1 %vm4242_vm10, %v3162_v13  ;;  %2951 = vmatpush1.bf16.msk.msra.mxu0 %vm2950_vm4, %v3162_v13  ;;  %vm4309_vm6 = vmpackc.low %vm932_vm7, %vm930_vm14  ;;  %vm675_vm7 = vcmp.eq.s32.totalorder %v5006_v22, %v3688_v52  ;;  %vm682_vm10 = vcmp.eq.s32.totalorder %v5011_v25, %v3691_v53  ;;  %vm681_vm4 = vcmp.eq.s32.totalorder %v5011_v25, %v3688_v52 }
  0xae   :  { %3013 = vmatprep.subr.msk.bf16.mxu1 %vm3012_vm2, %v3162_v13  ;;  %vm2952_vm14 = vmpackc.low %vm670_vm11, %vm668_vm13  ;;  %vm5008_vm13 = vcmp.eq.s32.totalorder %v5001_v17, %v4072_v26  ;;  %vm947_vm2 = vcmp.eq.s32.totalorder %v5010_v24, %v4072_v26 }
  0xaf   :  { %2953 = vmatprep.subr.msk.bf16.mxu0 %vm2952_vm14, %v3162_v13  ;;  %vm3016_vm11 = vmpackc.low %vm5008_vm13, %vm935_vm9  ;;  %vm5009_vm14 = vcmp.eq.s32.totalorder %v5000_v15, %v3688_v52  ;;  %vm680_vm13 = vcmp.eq.s32.totalorder %v5010_v24, %v3691_v53  ;;  %v4515_v15 = vld [vmem:[#allocation8] sm:$0xff] }
  0xb0   :  { %vm2954_vm9 = vmpackc.low %vm669_vm15, %vm5009_vm14  ;;  %vm5012_vm15 = vcmp.eq.s32.totalorder %v5001_v17, %v4068_v59  ;;  %vm679_vm14 = vcmp.eq.s32.totalorder %v5010_v24, %v3688_v52  ;;  %v4518_v17 = vsub.f32 %v4515_v15, %v1870_v55 }
  0xb1   :  { %3015 = vmatpush1.bf16.msk.msra.mxu1 %vm4309_vm6, %v3162_v13  ;;  %2955 = vmatpush1.bf16.msk.msra.mxu0 %vm2954_vm9, %v3162_v13  ;;  %vm4376_vm6 = vmpackc.low %vm5012_vm15, %vm934_vm5  ;;  %vm946_vm9 = vcmp.eq.s32.totalorder %v5010_v24, %v4068_v59  ;;  %vm5027_vm15 = vcmp.eq.s32.totalorder %v5007_v23, %v4072_v26  ;;  %v2289_v24 = vrot.slane %v2284_v20, 2 }
  0xb2   :  { %3017 = vmatprep.subr.msk.bf16.mxu1 %vm3016_vm11, %v3162_v13  ;;  %vm5016_vm11 = vcmp.eq.s32.totalorder %v5002_v18, %v3691_v53  ;;  %v1881_v37 = vrot.slane %v4518_v17, %v4220_v7  ;;  %v1885_v56 = vrot.slane %v4518_v17, %v4223_v8 }
  0xb3   :  { %vm2956_vm5 = vmpackc.low %vm674_vm0, %vm5016_vm11  ;;  %vm684_vm11 = vcmp.eq.s32.totalorder %v5018_v47, %v3691_v53 }
  0xb4   :  { %2957 = vmatprep.subr.msk.bf16.mxu0 %vm2956_vm5, %v3162_v13  ;;  %vm3020_vm0 = vmpackc.low %vm941_vm8, %vm939_vm12  ;;  %vm5026_vm12 = vcmp.eq.s32.totalorder %v5006_v22, %v4072_v26  ;;  %vm687_vm5 = vcmp.eq.s32.totalorder %v3623_v39, %v3688_v52  ;;  %v4596_v10 = vpack.c.bf16 %v1881_v37, %v1881_v37 }
  0xb5   :  { %3019 = vmatpush1.bf16.msk.msra.mxu1 %vm4376_vm6, %v3162_v13  ;;  %vm2958_vm8 = vmpackc.low %vm673_vm1, %vm671_vm3  ;;  %vm5020_vm3 = vcmp.eq.s32.totalorder %v5002_v18, %v4068_v59  ;;  %vm5021_vm1 = vcmp.eq.s32.totalorder %v5003_v19, %v4068_v59  ;;  %v2205_v18 = vcombine.low %v2197_v49, %v2198_v29  ;;  %v2282_v19 = vunpack.c.l.b16 %v4440_v33 }
  0xb6   :  { %3021 = vmatprep.subr.msk.bf16.mxu1 %vm3020_vm0, %v3162_v13  ;;  %2959 = vmatpush1.bf16.msk.msra.mxu0 %vm2958_vm8, %v3162_v13  ;;  %vm4450_vm6 = vmpackc.low %vm5021_vm1, %vm5020_vm3  ;;  %vm5024_vm0 = vcmp.eq.s32.totalorder %v5006_v22, %v3691_v53  ;;  %vm5025_vm8 = vcmp.eq.s32.totalorder %v5007_v23, %v3691_v53  ;;  %vm950_vm1 = vcmp.eq.s32.totalorder %v5018_v47, %v4068_v59  ;;  %v1902_v41 = vunpack.c.l.bf16 %v4596_v10 }
  0xb7   :  { %vm2960_vm3 = vmpackc.low %vm5025_vm8, %vm5024_vm0  ;;  %vm688_vm8 = vcmp.eq.s32.totalorder %v3623_v39, %v3691_v53  ;;  %v4558_v28 = vsub.f32 %v4515_v15, %v2205_v18  ;;  %v2288_v57 = vrot.slane %v2282_v19, 3  ;;  %v1899_v33 = vpack.c.bf16 %v1885_v56, %v1885_v56 }
  0xb8   :  { %2961 = vmatprep.subr.msk.bf16.mxu0 %vm2960_vm3, %v3162_v13  ;;  %vm3024_vm0 = vmpackc.low %vm5027_vm15, %vm5026_vm12  ;;  %vm5028_vm15 = vcmp.eq.s32.totalorder %v5007_v23, %v3688_v52  ;;  %vm689_vm3 = vcmp.eq.s32.totalorder %v3626_v40, %v3688_v52 }
  0xb9   :  { %3023 = vmatpush1.bf16.msk.msra.mxu1 %vm4450_vm6, %v3162_v13  ;;  %vm2962_vm12 = vmpackc.low %vm5028_vm15, %vm675_vm7  ;;  %vm5029_vm6 = vcmp.eq.s32.totalorder %v5006_v22, %v4068_v59  ;;  %vm5030_vm7 = vcmp.eq.s32.totalorder %v5007_v23, %v4068_v59  ;;  %v4531_v22 = vld [vmem:[#allocation8 + $0x8] sm:$0xff]  ;;  %v2216_v62 = vrot.slane %v4558_v28, %v4253_v16  ;;  %v2220_v11 = vrot.slane %v4558_v28, %v4320_v21 }
  0xba   :  { %3025 = vmatprep.subr.msk.bf16.mxu1 %vm3024_vm0, %v3162_v13  ;;  %2963 = vmatpush1.bf16.msk.msra.mxu0 %vm2962_vm12, %v3162_v13  ;;  %vm4507_vm15 = vmpackc.low %vm5030_vm7, %vm5029_vm6  ;;  %v4534_v23 = vsub.f32 %v4531_v22, %v1871_v46  ;;  %vm5033_vm7 = vcmask 1041409   ;;  %vm692_vm6 = vcmp.eq.s32.totalorder %v3640_v42, %v3691_v53  ;;  %vm694_vm12 = vcmp.eq.s32.totalorder %v3643_v43, %v3691_v53 }
  0xbb   :  { %vm2964_vm0 = vmpackc.low %vm682_vm10, %vm680_vm13  ;;  %v4537_v58 = vsel %vm5033_vm7, %v1954_v12, %v1953_v54  ;;  %vm5034_vm10 = vcmp.eq.s32.totalorder %v5011_v25, %v4072_v26  ;;  %vm961_vm7 = vcmp.eq.s32.totalorder %v3643_v43, %v4072_v26  ;;  %v4578_v9 = vsub.f32 %v4531_v22, %v2206_v5 }
  0xbc   :  { %2965 = vmatprep.subr.msk.bf16.mxu0 %vm2964_vm0, %v3162_v13  ;;  %vm3028_vm13 = vmpackc.low %vm5034_vm10, %vm947_vm2  ;;  %v1957_v36 = vpack.c.b16 %v4537_v58, %v4537_v58  ;;  %vm959_vm0 = vcmp.eq.s32.totalorder %v3640_v42, %v4072_v26  ;;  %v1889_v38 = vrot.slane %v4534_v23, %v4220_v7  ;;  %v1893_v50 = vrot.slane %v4534_v23, %v4223_v8 }
  0xbd   :  { %3027 = vmatpush1.bf16.msk.msra.mxu1 %vm4507_vm15, %v3162_v13  ;;  %vm2966_vm2 = vmpackc.low %vm681_vm4, %vm679_vm14  ;;  %vm5035_vm4 = vcmp.eq.s32.totalorder %v5011_v25, %v4068_v59  ;;  %vm691_vm15 = vcmp.eq.s32.totalorder %v3640_v42, %v3688_v52  ;;  %v2224_v31 = vrot.slane %v4578_v9, %v4253_v16  ;;  %v1903_v60 = vunpack.c.l.bf16 %v1899_v33 }
  0xbe   :  { %3029 = vmatprep.subr.msk.bf16.mxu1 %vm3028_vm13, %v3162_v13  ;;  %2967 = vmatpush1.bf16.msk.msra.mxu0 %vm2966_vm2, %v3162_v13  ;;  %vm4588_vm14 = vmpackc.low %vm5035_vm4, %vm946_vm9  ;;  %vm5038_vm9 = vcmp.eq.s32.totalorder %v5019_v35, %v3691_v53  ;;  %v4610_v25 = vpack.c.bf16 %v1889_v38, %v1889_v38  ;;  %v1901_v30 = vpack.c.bf16 %v1893_v50, %v1893_v50  ;;  %v1963_v0 = vunpack.c.l.b16 %v1899_v33 }
  0xbf   :  { %vm2968_vm13 = vmpackc.low %vm5038_vm9, %vm684_vm11  ;;  %vm5039_vm11 = vcmp.eq.s32.totalorder %v5018_v47, %v4072_v26  ;;  %vm5040_vm9 = vcmp.eq.s32.totalorder %v5019_v35, %v4072_v26  ;;  %v2228_v6 = vrot.slane %v4578_v9, %v4320_v21  ;;  %vm963_vm10 = vcmp.eq.s32.totalorder %v3646_v44, %v4072_v26 }
  0xc0   :  { %2969 = vmatprep.subr.msk.bf16.mxu0 %vm2968_vm13, %v3162_v13  ;;  %vm3032_vm2 = vmpackc.low %vm5040_vm9, %vm5039_vm11  ;;  %vm5041_vm13 = vcmp.eq.s32.totalorder %v5018_v47, %v3688_v52  ;;  %vm5042_vm11 = vcmp.eq.s32.totalorder %v5019_v35, %v3688_v52  ;;  %v1904_v55 = vunpack.c.l.bf16 %v4610_v25  ;;  %v1905_v54 = vunpack.c.l.bf16 %v1901_v30 }
  0xc1   :  { %3031 = vmatpush1.bf16.msk.msra.mxu1 %vm4588_vm14, %v3162_v13  ;;  %vm2970_vm9 = vmpackc.low %vm5042_vm11, %vm5041_vm13  ;;  %v1965_v49 = vunpack.c.l.b16 %v1901_v30  ;;  %v4644_v29 = vpack.c.bf16 %v2216_v62, %v2216_v62  ;;  %vm5043_vm14 = vcmp.eq.s32.totalorder %v5019_v35, %v4068_v59  ;;  %v1910_v12 = vcombine.low %v1902_v41, %v1903_v60 }
  0xc2   :  { %3033 = vmatprep.subr.msk.bf16.mxu1 %vm3032_vm2, %v3162_v13  ;;  %2971 = vmatpush1.bf16.msk.msra.mxu0 %vm2970_vm9, %v3162_v13  ;;  %vm4654_vm13 = vmpackc.low %vm5043_vm14, %vm950_vm1  ;;  %v2234_v51 = vpack.c.bf16 %v2220_v11, %v2220_v11  ;;  %v4662_v4 = vpack.c.bf16 %v2224_v31, %v2224_v31  ;;  %vm5046_vm1 = vcmp.eq.s32.totalorder %v3626_v40, %v3691_v53  ;;  %v1951_v46 = vrot.slane %v1948_v14, 1 }
  0xc3   :  { %vm2972_vm2 = vmpackc.low %vm5046_vm1, %vm688_vm8  ;;  %vm962_vm9 = vcmp.eq.s32.totalorder %v3646_v44, %v4068_v59  ;;  %vm964_vm14 = vcmp.eq.s32.totalorder %v3649_v45, %v4068_v59  ;;  %v1911_v47 = vcombine.low %v1904_v55, %v1905_v54  ;;  %v1968_v35 = vrot.slane %v1965_v49, 7 }
  0xc4   :  { %v2236_v18 = vpack.c.bf16 %v2228_v6, %v2228_v6  ;;  %v2237_v19 = vunpack.c.l.bf16 %v4644_v29  ;;  %2973 = vmatprep.subr.msk.bf16.mxu0 %vm2972_vm2, %v3162_v13  ;;  %vm5047_vm4 = vcmp.eq.s32.totalorder %v3623_v39, %v4072_v26  ;;  %vm5048_vm11 = vcmp.eq.s32.totalorder %v3626_v40, %v4072_v26  ;;  %vm2974_vm2 = vmpackc.low %vm689_vm3, %vm687_vm5 }
  0xc5   :  { %vm3036_vm8 = vmpackc.low %vm5048_vm11, %vm5047_vm4  ;;  %v1914_v32 = vsub.f32 %v4518_v17, %v1910_v12  ;;  %v2238_v20 = vunpack.c.l.bf16 %v2234_v51  ;;  %v2239_v5 = vunpack.c.l.bf16 %v4662_v4  ;;  %vm5049_vm1 = vcmask 1041409   ;;  %3035 = vmatpush1.bf16.msk.msra.mxu1 %vm4654_vm13, %v3162_v13 }
  0xc6   :  { %v2290_v37 = vsel %vm5049_vm1, %v2289_v24, %v2288_v57  ;;  %v1915_v56 = vsub.f32 %v4534_v23, %v1911_v47  ;;  %vm5050_vm4 = vcmask 1043459   ;;  %v2240_v38 = vunpack.c.l.bf16 %v2236_v18  ;;  %3037 = vmatprep.subr.msk.bf16.mxu1 %vm3036_vm8, %v3162_v13  ;;  %2975 = vmatpush1.bf16.msk.msra.mxu0 %vm2974_vm2, %v3162_v13  ;;  %vm2976_vm5 = vmpackc.low %vm694_vm12, %vm692_vm6 }
  0xc7   :  { %v1969_v17 = vsel %vm5050_vm4, %v1968_v35, %v1963_v0  ;;  %v2292_v50 = vpack.c.b16 %v2290_v37, %v2290_v37  ;;  %vm5051_vm13 = vcmp.eq.s32.totalorder %v3623_v39, %v4068_v59  ;;  %vm5052_vm11 = vcmp.eq.s32.totalorder %v3626_v40, %v4068_v59  ;;  %2977 = vmatprep.subr.msk.bf16.mxu0 %vm2976_vm5, %v3162_v13  ;;  %vm3040_vm3 = vmpackc.low %vm961_vm7, %vm959_vm0 }
  0xc8   :  { %vm4705_vm1 = vmpackc.low %vm5052_vm11, %vm5051_vm13  ;;  %v1925_v23 = vrot.slane %v1914_v32, %v4223_v8  ;;  %v1971_v48 = vpack.c.b16 %v1969_v17, %v1969_v17  ;;  %v2245_v33 = vcombine.low %v2237_v19, %v2238_v20  ;;  %v2298_v62 = vunpack.c.l.b16 %v2234_v51 }
  0xc9   :  { %v1933_v39 = vrot.slane %v1915_v56, %v4223_v8  ;;  %v2246_v24 = vcombine.low %v2239_v5, %v2240_v38  ;;  %v2300_v40 = vunpack.c.l.b16 %v2236_v18  ;;  %v1921_v30 = vrot.slane %v1914_v32, %v4220_v7  ;;  %3039 = vmatpush1.bf16.msk.msra.mxu1 %vm4705_vm1, %v3162_v13 }
  0xca   :  { %v1939_v11 = vpack.c.bf16 %v1925_v23, %v1925_v23  ;;  %vm5055_vm12 = vcmask 1040384   ;;  %v2249_v8 = vsub.f32 %v4558_v28, %v2245_v33  ;;  %v2303_v41 = vrot.slane %v2298_v62, 1  ;;  %3041 = vmatprep.subr.msk.bf16.mxu1 %vm3040_vm3, %v3162_v13 }
  0xcb   :  { %v1993_v31 = vsel %vm5055_vm12, %v1957_v36, %v1971_v48  ;;  %vm5056_vm6 = vcmp.eq.s32.totalorder %v3643_v43, %v3688_v52  ;;  %v1941_v60 = vpack.c.bf16 %v1933_v39, %v1933_v39  ;;  %v2250_v0 = vsub.f32 %v4578_v9, %v2246_v24 }
  0xcc   :  { %vm2978_vm0 = vmpackc.low %vm5056_vm6, %vm691_vm15  ;;  %v1929_v58 = vrot.slane %v1915_v56, %v4220_v7  ;;  %v1938_v36 = vpack.c.bf16 %v1921_v30, %v1921_v30  ;;  %vm5057_vm7 = vcmp.eq.s32.totalorder %v3640_v42, %v4068_v59  ;;  %vm5058_vm8 = vcmp.eq.s32.totalorder %v3643_v43, %v4068_v59 }
  0xcd   :  { %2979 = vmatpush1.bf16.msk.msra.mxu0 %vm2978_vm0, %v3162_v13  ;;  %vm4749_vm2 = vmpackc.low %vm5058_vm8, %vm5057_vm7  ;;  %v1977_v6 = vunpack.c.l.b16 %v1939_v11  ;;  %v2260_v9 = vrot.slane %v2249_v8, %v4320_v21  ;;  %v1950_v55 = vrot.slane %v1946_v63, 2  ;;  %vm5063_vm13 = vcmp.eq.s32.totalorder %v3649_v45, %v3691_v53 }
  0xce   :  { %vm5061_vm15 = vmmov %vm5050_vm4  ;;  %vm5062_vm4 = vcmp.eq.s32.totalorder %v3646_v44, %v3691_v53  ;;  %v1979_v42 = vunpack.c.l.b16 %v1941_v60  ;;  %v2268_v43 = vrot.slane %v2250_v0, %v4320_v21  ;;  %v1940_v49 = vpack.c.bf16 %v1929_v58, %v1929_v58  ;;  %3043 = vmatpush1.bf16.msk.msra.mxu1 %vm4749_vm2, %v3162_v13 }
  0xcf   :  { %v2304_v7 = vsel %vm5061_vm15, %v2300_v40, %v2303_v41  ;;  %vm2980_vm11 = vmpackc.low %vm5063_vm13, %vm5062_vm4  ;;  %vm5064_vm1 = vcmp.eq.s32.totalorder %v3649_v45, %v4072_v26  ;;  %v1983_v34 = vrot.slane %v1977_v6, 6  ;;  %v2274_v63 = vpack.c.bf16 %v2260_v9, %v2260_v9 }
  0xd0   :  { %v2306_v54 = vpack.c.b16 %v2304_v7, %v2304_v7  ;;  %2981 = vmatprep.subr.msk.bf16.mxu0 %vm2980_vm11, %v3162_v13  ;;  %vm3044_vm5 = vmpackc.low %vm5064_vm1, %vm963_vm10  ;;  %v1962_v53 = vunpack.c.l.b16 %v4596_v10  ;;  %vm5065_vm3 = vcmp.eq.s32.totalorder %v3646_v44, %v3688_v52  ;;  %vm5066_vm12 = vcmp.eq.s32.totalorder %v3649_v45, %v3688_v52 }
  0xd1   :  { %vm2982_vm6 = vmpackc.low %vm5066_vm12, %vm5065_vm3  ;;  %v1984_v21 = vrot.slane %v1979_v42, 5  ;;  %v2276_v12 = vpack.c.bf16 %v2268_v43, %v2268_v43  ;;  %vm5067_vm0 = vcmask 1040384   ;;  %v1964_v51 = vunpack.c.l.b16 %v4610_v25  ;;  %3045 = vmatprep.subr.msk.bf16.mxu1 %vm3044_vm5, %v3162_v13 }
  0xd2   :  { %v2328_v26 = vsel %vm5067_vm0, %v2292_v50, %v2306_v54  ;;  %2983 = vmatpush1.bf16.msk.msra.mxu0 %vm2982_vm6, %v3162_v13  ;;  %vm3046_vm10 = vmpackc.low %vm964_vm14, %vm962_vm9  ;;  %v2312_v10 = vunpack.c.l.b16 %v2274_v63  ;;  %vm5068_vm7 = vcmask 1041409   ;;  %v1976_v14 = vunpack.c.l.b16 %v1938_v36 }
  0xd3   :  { %v1952_v52 = vsel %vm5068_vm7, %v1951_v46, %v1950_v55  ;;  %v1978_v47 = vunpack.c.l.b16 %v1940_v49  ;;  %vm5069_vm8 = vcmask 1045509   ;;  %v2314_v18 = vunpack.c.l.b16 %v2276_v12  ;;  %3047 = vmatpush1.bf16.msk.msra.mxu1 %vm3046_vm10, %v3162_v13  ;;  %vm5070_vm2 = vmmov %vm5061_vm15  ;;  %v1161_v55 = vld [vmem:[#allocation6] sm:$0x3]  ;;  %v1162_v49 = vld [vmem:[#allocation6 + $0x2] sm:$0x3] }
  0xd4   :  { %v1985_v35 = vsel %vm5069_vm8, %v1984_v21, %v1983_v34  ;;  %v1956_v25 = vpack.c.b16 %v1952_v52, %v1952_v52  ;;  %v1966_v19 = vrot.slane %v1964_v51, 7  ;;  %v2318_v20 = vrot.slane %v2312_v10, 7  ;;  %vm5072_vm14 = vmmov %vm5069_vm8 }
  0xd5   :  { %v1987_v32 = vpack.c.b16 %v1985_v35, %v1985_v35  ;;  %v1980_v5 = vrot.slane %v1976_v14, 6  ;;  %v1981_v37 = vrot.slane %v1978_v47, 5  ;;  %v2319_v44 = vrot.slane %v2314_v18, 6  ;;  %vm5073_vm15 = vmmov %vm5069_vm8 }
  0xd6   :  { %v1967_v45 = vsel %vm5070_vm2, %v1966_v19, %v1962_v53  ;;  %v2256_v59 = vrot.slane %v2249_v8, %v4253_v16  ;;  %v2264_v56 = vrot.slane %v2250_v0, %v4253_v16  ;;  %vm5071_vm9 = vcmask 1041408   ;;  %vm5074_vm4 = vmmov %vm5067_vm0 }
  0xd7   :  { %v1998_v17 = vsel %vm5071_vm9, %v1993_v31, %v1987_v32  ;;  %v1970_v38 = vpack.c.b16 %v1967_v45, %v1967_v45  ;;  %v1982_v50 = vsel %vm5072_vm14, %v1981_v37, %v1980_v5  ;;  %v2281_v57 = vunpack.c.l.b16 %v4438_v61  ;;  %vm5075_vm13 = vmmov %vm5071_vm9 }
  0xd8   :  { %2065 = vmatprep.mubr.bf16.mxu0 %v1998_v17  ;;  %v2320_v23 = vsel %vm5073_vm15, %v2319_v44, %v2318_v20  ;;  %v1986_v48 = vpack.c.b16 %v1982_v50, %v1982_v50  ;;  %v2273_v33 = vpack.c.bf16 %v2256_v59, %v2256_v59  ;;  %v2275_v13 = vpack.c.bf16 %v2264_v56, %v2264_v56  ;;  %vm5076_vm11 = vmmov %vm5071_vm9 }
  0xd9   :  { %v2322_v62 = vpack.c.b16 %v2320_v23, %v2320_v23  ;;  %v1990_v39 = vsel %vm5074_vm4, %v1956_v25, %v1970_v38  ;;  %v2283_v24 = vunpack.c.l.b16 %v4459_v27  ;;  %v2285_v40 = vrot.slane %v2281_v57, 3  ;;  %vm5077_vm1 = vmmov %vm5068_vm7 }
  0xda   :  { %v1995_v16 = vsel %vm5075_vm13, %v1990_v39, %v1986_v48  ;;  %v2297_v30 = vunpack.c.l.b16 %v4644_v29  ;;  %v2299_v11 = vunpack.c.l.b16 %v4662_v4  ;;  %v2311_v31 = vunpack.c.l.b16 %v2273_v33  ;;  %vm5078_vm5 = vmmov %vm5070_vm2 }
  0xdb   :  { %v2333_v61 = vsel %vm5076_vm11, %v2328_v26, %v2322_v62  ;;  %2066 = vmatmul.mubr.bf16.vlgmr.msra.gmra.mrb[4].mxu0 %v1995_v16  ;;  %v2286_v8 = vrot.slane %v2283_v24, 2  ;;  %v2313_v41 = vunpack.c.l.b16 %v2275_v13  ;;  %vm5079_vm3 = vmmov %vm5069_vm8  ;;  %v1421_v42 = vsub.f32 1.0, %v1161_v55 }
  0xdc   :  { %2400 = vmatprep.mubr.bf16.mxu1 %v2333_v61  ;;  %v2301_v60 = vrot.slane %v2297_v30, 1  ;;  %v2315_v0 = vrot.slane %v2311_v31, 7  ;;  %vm5080_vm12 = vmmov %vm5067_vm0  ;;  %v1755_v63 = vsub.f32 1.0, %v1162_v49  ;;  %v1441_v14 = vrot.slane %v1161_v55, %v3239_v3 }
  0xdd   :  { %v2287_v58 = vsel %vm5077_vm1, %v2286_v8, %v2285_v40  ;;  %v2316_v36 = vrot.slane %v2313_v41, 6  ;;  %vm5081_vm6 = vmmov %vm5071_vm9  ;;  %v1426_v43 = vrot.slane %v1421_v42, %v3239_v3  ;;  %v1430_v54 = vrot.slane %v1421_v42, %v3236_v2 }
  0xde   :  { %v2291_v27 = vpack.c.b16 %v2287_v58, %v2287_v58  ;;  %v2302_v28 = vsel %vm5078_vm5, %v2299_v11, %v2301_v60  ;;  %v1760_v35 = vrot.slane %v1755_v63, %v3239_v3  ;;  %v1764_v18 = vrot.slane %v1755_v63, %v3236_v2 }
  0xdf   :  { %v2305_v6 = vpack.c.b16 %v2302_v28, %v2302_v28  ;;  %v2317_v29 = vsel %vm5079_vm3, %v2316_v36, %v2315_v0  ;;  %v1431_v12 = vcombine.low %v1426_v43, %v1430_v54  ;;  %v1445_v19 = vrot.slane %v1161_v55, %v3236_v2 }
  0xe0   :  { %v2321_v9 = vpack.c.b16 %v2317_v29, %v2317_v29  ;;  %v3163_v5 = vmov 1966171168   ;;  %v1765_v48 = vcombine.low %v1760_v35, %v1764_v18  ;;  %v1775_v62 = vrot.slane %v1162_v49, %v3239_v3 }
  0xe1   :  { %v2325_v4 = vsel %vm5080_vm12, %v2291_v27, %v2305_v6  ;;  %v1432_v20 = vrot.slane %v1431_v12, 1  ;;  %v1469_v37 = vunpack.c.l.s4 %v3163_v5  ;;  %v1435_v50 = vmul.f32 %v4515_v15, %v1431_v12 }
  0xe2   :  { %v2330_v7 = vsel %vm5081_vm6, %v2325_v4, %v2321_v9  ;;  %v1779_v31 = vrot.slane %v1162_v49, %v3236_v2  ;;  %v1766_v0 = vrot.slane %v1765_v48, 7  ;;  %v1770_v28 = vmul.f32 %v4531_v22, %v1765_v48 }
  0xe3   :  { %2401 = vmatmul.mubr.bf16.vlgmr.msra.gmra.mrb[4].mxu1 %v2330_v7  ;;  %v1436_v39 = vmul.f32 %v4531_v22, %v1432_v20  ;;  %v1470_v24 = vunpack.c.0.s8 %v1469_v37  ;;  %v3164_v29 = vmov 0.0  }
  0xe4   :  { %v1769_v7 = vmul.f32 %v4515_v15, %v1766_v0 }
  0xe5   :  { %v4823_v36 = vsub.s32 %v1470_v24, %v3233_v1 }
 0x160   :  { %v1400_v34 = vpop.f32.mrb[0].mxu0 }
 0x161   :  { %v1409_v46 = vrot.slane %v1400_v34, 2  ;;  %v1415_v53 = vrot.slane %v1400_v34, 4  ;;  %v1402_v21 = vpop.f32.mrb[1].mxu0 }
 0x162   :  { %v1410_v26 = vrot.slane %v1402_v21, 2  ;;  %v1416_v51 = vrot.slane %v1402_v21, 4  ;;  %v1404_v10 = vpop.f32.mrb[2].mxu0 }
 0x163   :  { %v1413_v52 = vadd.f32 %v1409_v46, %v1400_v34  ;;  %v1405_v47 = vpop.f32.mrb[3].mxu0  ;;  %v5082_v34 = vlaneseq }
 0x164   :  { %v1414_v25 = vadd.f32 %v1410_v26, %v1402_v21 }
 0x165   :  { %v1419_v32 = vadd.f32 %v1415_v53, %v1413_v52  ;;  %vm4833_vm7 = vcmp.lt.s32.totalorder %v5082_v34, 256 }
 0x166   :  { %v1420_v45 = vadd.f32 %v1416_v51, %v1414_v25 }
 0x167   :  { %v1734_v44 = vpop.f32.mrb[0].mxu1  ;;  %v1448_v59 = vmul.f32 %v1441_v14, %v1419_v32  ;;  %v1163_v32 = vld [vmem:[#allocation6 + $0x4] sm:$0x3] }
 0x168   :  { %v1743_v56 = vrot.slane %v1734_v44, 2  ;;  %v1749_v17 = vrot.slane %v1734_v44, 4  ;;  %v1736_v38 = vpop.f32.mrb[1].mxu1  ;;  %v1449_v57 = vmul.f32 %v1445_v19, %v1420_v45  ;;  %v2088_v20 = vsub.f32 1.0, %v1163_v32 }
 0x169   :  { %v1744_v23 = vrot.slane %v1736_v38, 2  ;;  %v1738_v33 = vpop.f32.mrb[2].mxu1  ;;  %v1750_v11 = vrot.slane %v1736_v38, 4  ;;  %v2113_v24 = vrot.slane %v1163_v32, %v3236_v2 }
 0x16a   :  { %v1747_v13 = vadd.f32 %v1743_v56, %v1734_v44  ;;  %v1739_v40 = vpop.f32.mrb[3].mxu1  ;;  %v1452_v16 = vcombine.low %v1448_v59, %v1449_v57  ;;  %v2093_v5 = vrot.slane %v2088_v20, %v3239_v3  ;;  %v2097_v37 = vrot.slane %v2088_v20, %v3236_v2  ;;  %v1164_v44 = vld [vmem:[#allocation6 + $0x6] sm:$0x3] }
 0x16b   :  { %v1748_v30 = vadd.f32 %v1744_v23, %v1736_v38 }
 0x16c   :  { %v1753_v61 = vadd.f32 %v1749_v17, %v1747_v13  ;;  %v1453_v8 = vrot.slane %v1452_v16, 1  ;;  %v1456_v41 = vadd.f32 %v1452_v16, %v1435_v50  ;;  %v2423_v17 = vsub.f32 1.0, %v1164_v44 }
 0x16d   :  { %v1754_v60 = vadd.f32 %v1750_v11, %v1748_v30  ;;  %v2098_v50 = vcombine.low %v2093_v5, %v2097_v37  ;;  %v2109_v13 = vrot.slane %v1163_v32, %v3239_v3 }
 0x16e   :  { %v1782_v58 = vmul.f32 %v1775_v62, %v1753_v61  ;;  %v1457_v27 = vadd.f32 %v1453_v8, %v1436_v39  ;;  %vm1458_vm0 = vcmp.gt.f32.partialorder %v1456_v41, 0.0  ;;  %v2428_v16 = vrot.slane %v2423_v17, %v3239_v3 }
 0x16f   :  { %v1783_v6 = vmul.f32 %v1779_v31, %v1754_v60  ;;  %v2784_v9 = vsel %vm1458_vm0, 1.0, %v3164_v29  ;;  %v2432_v30 = vrot.slane %v2423_v17, %v3236_v2  ;;  %v2099_v31 = vrot.slane %v2098_v50, 6 }
 0x170   :  { %vm1459_vm10 = vcmp.gt.f32.partialorder %v1457_v27, 0.0  ;;  %v1464_v4 = vmul.f32 %v4515_v15, %v2784_v9  ;;  %v2100_v61 = vrot.slane %v2098_v50, 7 }
 0x171   :  { %v1786_v55 = vcombine.low %v1782_v58, %v1783_v6  ;;  %v2785_v42 = vsel %vm1459_vm10, 1.0, %v3164_v29  ;;  %v2433_v58 = vcombine.low %v2428_v16, %v2432_v30 }
 0x172   :  { %v1465_v43 = vmul.f32 %v4531_v22, %v2785_v42  ;;  %v1474_v1 = vrot.slane %v1464_v4, %v4823_v36  ;;  %v2104_v6 = vmul.f32 %v4531_v22, %v2100_v61 }
 0x173   :  { %v1787_v54 = vrot.slane %v1786_v55, 7  ;;  %v1791_v49 = vadd.f32 %v1786_v55, %v1770_v28  ;;  %v2103_v28 = vmul.f32 %v4515_v15, %v2099_v31 }
 0x174   :  { %v1481_v46 = vrot.slane %v1474_v1, %v4823_v36  ;;  %v1488_v53 = vrot.slane %v1465_v43, %v4823_v36  ;;  %v2444_v43 = vrot.slane %v1164_v44, %v3239_v3  ;;  %v2448_v1 = vrot.slane %v1164_v44, %v3236_v2 }
 0x175   :  { %v1790_v21 = vadd.f32 %v1787_v54, %v1769_v7  ;;  %vm1793_vm8 = vcmp.gt.f32.partialorder %v1791_v49, 0.0 }
 0x176   :  { %v2787_v12 = vsel %vm1793_vm8, 1.0, %v3164_v29  ;;  %v1495_v26 = vrot.slane %v1488_v53, %v4823_v36  ;;  %1502 = vst.msk [vmem:[#allocation9] ss:$4 sm:$0x3] %vm4833_vm7, %v1481_v46 }
 0x177   :  { %vm1792_vm2 = vcmp.gt.f32.partialorder %v1790_v21, 0.0  ;;  %v1799_v51 = vmul.f32 %v4531_v22, %v2787_v12  ;;  %v2434_v12 = vrot.slane %v2433_v58, 5 }
 0x178   :  { %v2786_v10 = vsel %vm1792_vm2, 1.0, %v3164_v29  ;;  %1504 = vst.msk [vmem:[#allocation9 + $0x8] ss:$4 sm:$0x3] %vm4833_vm7, %v1495_v26 }
 0x179   :  { %v1798_v52 = vmul.f32 %v4515_v15, %v2786_v10  ;;  %v1823_v14 = vrot.slane %v1799_v51, %v4823_v36  ;;  %v2438_v2 = vmul.f32 %v4515_v15, %v2434_v12 }
 0x17b   :  { %v1808_v47 = vrot.slane %v1798_v52, %v4823_v36  ;;  %v1824_v35 = vcombine.high %v1823_v14, %v1823_v14  ;;  %v2435_v52 = vrot.slane %v2433_v58, 6 }
 0x17d   :  { %v1809_v18 = vcombine.high %v1808_v47, %v1808_v47  ;;  %v1831_v25 = vrot.slane %v1824_v35, %v4823_v36 }
 0x17f   :  { %v1816_v19 = vrot.slane %v1809_v18, %v4823_v36  ;;  %1837 = vst.msk [vmem:[#allocation9 + $0x9] ss:$4 sm:$0x3] %vm4833_vm7, %v1831_v25 }
 0x181   :  { %1835 = vst.msk [vmem:[#allocation9 + $0x1] ss:$4 sm:$0x3] %vm4833_vm7, %v1816_v19  ;;  %v2439_v19 = vmul.f32 %v4531_v22, %v2435_v52 }
 0x1ae   :  { %v2067_v45 = vpop.f32.mrb[4].mxu0 }
 0x1af   :  { %v2076_v59 = vrot.slane %v2067_v45, 2  ;;  %v2082_v56 = vrot.slane %v2067_v45, 4  ;;  %v2069_v38 = vpop.f32.mrb[5].mxu0 }
 0x1b0   :  { %v2077_v57 = vrot.slane %v2069_v38, 2  ;;  %v2083_v23 = vrot.slane %v2069_v38, 4  ;;  %v2071_v48 = vpop.f32.mrb[6].mxu0 }
 0x1b1   :  { %v2080_v33 = vadd.f32 %v2076_v59, %v2067_v45  ;;  %v2072_v62 = vpop.f32.mrb[7].mxu0 }
 0x1b2   :  { %v2081_v39 = vadd.f32 %v2077_v57, %v2069_v38 }
 0x1b3   :  { %v2086_v40 = vadd.f32 %v2082_v56, %v2080_v33 }
 0x1b4   :  { %v2087_v11 = vadd.f32 %v2083_v23, %v2081_v39 }
 0x1b5   :  { %v2116_v8 = vmul.f32 %v2109_v13, %v2086_v40 }
 0x1b6   :  { %v2402_v41 = vpop.f32.mrb[4].mxu1  ;;  %v2117_v60 = vmul.f32 %v2113_v24, %v2087_v11 }
 0x1b7   :  { %v2411_v0 = vrot.slane %v2402_v41, 2  ;;  %v2404_v27 = vpop.f32.mrb[5].mxu1  ;;  %v2417_v42 = vrot.slane %v2402_v41, 4 }
 0x1b8   :  { %v2120_v9 = vcombine.low %v2116_v8, %v2117_v60  ;;  %v2412_v4 = vrot.slane %v2404_v27, 2  ;;  %v2406_v7 = vpop.f32.mrb[6].mxu1  ;;  %v2418_v53 = vrot.slane %v2404_v27, 4 }
 0x1b9   :  { %v2415_v55 = vadd.f32 %v2411_v0, %v2402_v41  ;;  %v2407_v54 = vpop.f32.mrb[7].mxu1 }
 0x1ba   :  { %v2121_v49 = vrot.slane %v2120_v9, 6  ;;  %v2122_v34 = vrot.slane %v2120_v9, 7  ;;  %v2416_v46 = vadd.f32 %v2412_v4, %v2404_v27 }
 0x1bb   :  { %v2421_v21 = vadd.f32 %v2417_v42, %v2415_v55 }
 0x1bc   :  { %v2125_v26 = vadd.f32 %v2121_v49, %v2103_v28  ;;  %v2126_v51 = vadd.f32 %v2122_v34, %v2104_v6  ;;  %v2422_v10 = vadd.f32 %v2418_v53, %v2416_v46 }
 0x1bd   :  { %v2451_v14 = vmul.f32 %v2444_v43, %v2421_v21 }
 0x1be   :  { %vm2127_vm9 = vcmp.gt.f32.partialorder %v2125_v26, 0.0  ;;  %vm2128_vm14 = vcmp.gt.f32.partialorder %v2126_v51, 0.0  ;;  %v2452_v47 = vmul.f32 %v2448_v1, %v2422_v10 }
 0x1bf   :  { %v2788_v35 = vsel %vm2127_vm9, 1.0, %v3164_v29  ;;  %v2789_v3 = vsel %vm2128_vm14, 1.0, %v3164_v29 }
 0x1c0   :  { %v2133_v18 = vmul.f32 %v4515_v15, %v2788_v35  ;;  %v2134_v25 = vmul.f32 %v4531_v22, %v2789_v3  ;;  %v2455_v32 = vcombine.low %v2451_v14, %v2452_v47 }
 0x1c2   :  { %v2143_v20 = vrot.slane %v2133_v18, %v4823_v36  ;;  %v2158_v5 = vrot.slane %v2134_v25, %v4823_v36  ;;  %v2456_v37 = vrot.slane %v2455_v32, 5  ;;  %v2457_v44 = vrot.slane %v2455_v32, 6 }
 0x1c4   :  { %v2150_v45 = vrot.slane %v2143_v20, %v4823_v36  ;;  %v2165_v59 = vrot.slane %v2158_v5, %v4823_v36  ;;  %v2460_v56 = vadd.f32 %v2456_v37, %v2438_v2  ;;  %v2461_v17 = vadd.f32 %v2457_v44, %v2439_v19 }
 0x1c6   :  { %v2151_v38 = vcombine.high %v2150_v45, %v2150_v45  ;;  %v2166_v50 = vcombine.high %v2165_v59, %v2165_v59  ;;  %vm2462_vm15 = vcmp.gt.f32.partialorder %v2460_v56, 0.0  ;;  %vm2463_vm4 = vcmp.gt.f32.partialorder %v2461_v17, 0.0 }
 0x1c7   :  { %v2790_v57 = vsel %vm2462_vm15, 1.0, %v3164_v29  ;;  %v2791_v23 = vsel %vm2463_vm4, 1.0, %v3164_v29 }
 0x1c8   :  { %2170 = vst.msk [vmem:[#allocation9 + $0x2] ss:$4 sm:$0x3] %vm4833_vm7, %v2151_v38  ;;  %2172 = vst.msk [vmem:[#allocation9 + $0xa] ss:$4 sm:$0x3] %vm4833_vm7, %v2166_v50  ;;  %v2468_v48 = vmul.f32 %v4515_v15, %v2790_v57  ;;  %v2469_v33 = vmul.f32 %v4531_v22, %v2791_v23 }
 0x1ca   :  { %v2478_v13 = vrot.slane %v2468_v48, %v4823_v36  ;;  %v2494_v62 = vrot.slane %v2469_v33, %v4823_v36 }
 0x1cc   :  { %v2479_v39 = vcombine.high %v2478_v13, %v2478_v13  ;;  %v2495_v24 = vcombine.high %v2494_v62, %v2494_v62 }
 0x1ce   :  { %v2486_v29 = vrot.slane %v2479_v39, %v4823_v36  ;;  %v2502_v40 = vrot.slane %v2495_v24, %v4823_v36 }
 0x1d0   :  { %v2487_v16 = vcombine.high %v2486_v29, %v2486_v29  ;;  %v2503_v30 = vcombine.high %v2502_v40, %v2502_v40 }
 0x1d2   :  { %2507 = vst.msk [vmem:[#allocation9 + $0x3] ss:$4 sm:$0x3] %vm4833_vm7, %v2487_v16  ;;  %2509 = vst.msk [vmem:[#allocation9 + $0xb] ss:$4 sm:$0x3] %vm4833_vm7, %v2503_v30 }
 0x1d3   :  { %3138 = shalt.err (!%p3135_p0)
}
 0x1d4   :  { %s3139_s27 = scalar_lea.hbm %s4910_s3, 256 }
 0x1d5   :  { %p3140_p1 = scmp.ne.s32.totalorder %s4910_s3, %s3139_s27  ;;  %p3143_p2 = scmp.lt.u32.totalorder %s3139_s27, %s4910_s3 }
 0x1d7   :  { %p3145_p3 = pnand %p3143_p2, %p3140_p1 }
 0x1d9   :  { %3148 = shalt.err (!%p3145_p3)
}
 0x1da   :  { %2521 = dma.vmem_to_hbm [thread:$0]  %s2516_s23, 256, %s4910_s3, [#allocation5], %s3160_s0, %s3160_s0, %s3161_s15  }
 0x1db   :  { %3153 = dma.done.wait [#allocation5], 256  }
 0x1dc   :  { %3154 = vsyncadd [#allocation5], 4294967040 }
 0x1dd   :  { %2525 = vsyncpa [#allocation4], 1 }
 0x1de   :  { %2526 = vsyncpa [#allocation7], 1 }
 0x1df   :  { %2527 = vsyncpa [#allocation5], 1 }

</bundles_post_ra>
